<compile_context>
chip_gen: v7x
topology: tpu7x:2x2x1
jax: 0.10.0
libtpu: 0.0.40
codegen_flags: <defaults>
</compile_context>

<pallas_src>
import functools

import jax
import jax.numpy as jnp
from jax.experimental import pallas as pl
from jax.experimental.pallas import tpu as pltpu

LN_EPS = 1e-5  # torch nn.LayerNorm default
_HIGHEST = jax.lax.Precision.HIGHEST


def _recurrence_kernel(time_block, batch_chunks, unroll,
                       proj_ref,    # (T, TB, D) pre-projected inputs (this block)
                       a_ref,       # (D, D)  global_state_control (resident)
                       ln_w_ref,    # (1, D)  layer_norm weight
                       ln_b_ref,    # (1, D)  layer_norm bias
                       out_ref,     # (T, TB, D) normalized states (output)
                       state_ref):  # VMEM scratch (TB, D), persists across grid steps
    # First time block of this batch block -> reset the carried state.
    @pl.when(pl.program_id(1) == 0)
    def _init():
        state_ref[...] = jnp.zeros_like(state_ref)

    tb, d = state_ref.shape
    chunk = tb // batch_chunks

    a = a_ref[...]
    # Hoisted out of the loop: JAX does not CSE broadcast_in_dim and the loop
    # body below is (partially) unrolled.
    ln_w = jnp.broadcast_to(ln_w_ref[...], (tb, d))
    ln_b = jnp.broadcast_to(ln_b_ref[...], (tb, d))

    def step(i, state):
        p = proj_ref[i].astype(jnp.float32)          # (TB, D)
        new_chunks = []
        # Independent batch chunks: chunk c+1's MXU matmul can overlap chunk
        # c's LayerNorm (VPU/XLU/EUP) in the same basic block.
        for c in range(batch_chunks):
            lo, hi = c * chunk, (c + 1) * chunk
            # The only op left on the serial critical path.  Kept at HIGHEST
            # precision: it is a tiny fraction of total FLOPs and the serial
            # LN recurrence is where f32 fidelity matters.
            s = jnp.dot(state[lo:hi], a,
                        preferred_element_type=jnp.float32,
                        precision=_HIGHEST) + p[lo:hi]
            # One-pass LayerNorm: two independent cross-lane reductions, then
            # a fused scale/shift tail (one mul + one add).
            mean = jnp.mean(s, axis=-1, keepdims=True)
            mean_sq = jnp.mean(s * s, axis=-1, keepdims=True)
            inv = jax.lax.rsqrt(mean_sq - mean * mean + LN_EPS)
            scale = inv * ln_w[lo:hi]
            shift = ln_b[lo:hi] - mean * scale
            new_chunks.append(s * scale + shift)
        s_new = (new_chunks[0] if batch_chunks == 1
                 else jnp.concatenate(new_chunks, axis=0))
        out_ref[i] = s_new.astype(out_ref.dtype)
        return s_new

    state_ref[...] = jax.lax.fori_loop(0, time_block, step, state_ref[...],
                                       unroll=unroll)


def _pick_batch_block(batch):
    # >=2 batch blocks (each a multiple of 8 sublanes) lets the "parallel"
    # batch grid axis shard across v7x's two TensorCores.
    if batch % 16 == 0:
        return batch // 2
    return batch


def _pick_time_block(seq_len, tb, d, max_block=256,
                     budget_bytes=24 * 1024 * 1024):
    # proj + states blocks are double-buffered: 2 arrays * 2 buffers * T*TB*D*4.
    per_step = 2 * 2 * tb * d * 4
    t_cap = max(1, budget_bytes // per_step)
    return int(max(1, min(seq_len, max_block, t_cap)))


def attention_forward(x, params, *, projection_precision=None):
    """x: [B, S, E] float32. Returns [B, S, E].

    `projection_precision` controls only the two hoisted (non-recurrent)
    projection einsums, which carry >95% of the FLOPs; leave it None (JAX
    default / bf16 MXU rate) in production, pass Precision.HIGHEST when
    validating against a full-f32 reference.
    """
    B, S, E = x.shape
    D = params["A"].shape[0]

    TB = _pick_batch_block(B)
    batch_chunks = 2 if TB % 16 == 0 else 1      # each chunk >= 8 sublanes
    T = _pick_time_block(S, TB, D)
    S_pad = -(-S // T) * T
    unroll = min(T, 8)

    # ---- algebraic fusion (tiny one-off matmuls, kept at full precision) ----
    W_in = jnp.dot(params["W_e2s"], params["B_in"], precision=_HIGHEST)   # (E, D)
    b_in = jnp.dot(params["b_e2s"], params["B_in"], precision=_HIGHEST)   # (1, D)
    W_out = jnp.dot(params["C"], params["W_s2o"], precision=_HIGHEST)     # (D, E)

    # ---- hoisted, batched input projection (folds b,s -> s,b transpose) ----
    proj = jnp.einsum("bse,ed->sbd", x, W_in,
                      precision=projection_precision) + b_in              # (S, B, D)
    proj = proj.astype(jnp.float32)
    if S_pad != S:
        # Pad the time axis instead of shrinking T: padded steps run AFTER all
        # real steps and are trimmed below, so they cannot affect real outputs.
        proj = jnp.pad(proj, ((0, S_pad - S), (0, 0), (0, 0)))

    # ---- explicit scoped-VMEM budget ----
    block_bytes = T * TB * D * 4
    weight_bytes = D * D * 4 + 4 * D * 4          # A (single-buffered) + ln_w/ln_b
    vmem_needed = 2 * 2 * block_bytes + weight_bytes + TB * D * 4
    vmem_limit = int(min(max(2 * vmem_needed, 32 * 1024 * 1024),
                         64 * 1024 * 1024))

    resident = dict(pipeline_mode=pl.Buffered(1))  # constant index_map -> 1 buffer

    # ---- serial recurrence kernel (state @ A + proj, LayerNorm) ----
    states = pl.pallas_call(
        functools.partial(_recurrence_kernel, T, batch_chunks, unroll),
        out_shape=jax.ShapeDtypeStruct((S_pad, B, D), jnp.float32),
        grid_spec=pltpu.PrefetchScalarGridSpec(
            num_scalar_prefetch=0,
            grid=(B // TB, S_pad // T),
            in_specs=[
                pl.BlockSpec((T, TB, D), lambda b, t: (t, b, 0)),   # proj block
                pl.BlockSpec((D, D), lambda b, t: (0, 0), **resident),   # A
                pl.BlockSpec((1, D), lambda b, t: (0, 0), **resident),   # ln_w
                pl.BlockSpec((1, D), lambda b, t: (0, 0), **resident),   # ln_b
            ],
            out_specs=pl.BlockSpec((T, TB, D), lambda b, t: (t, b, 0)),
            scratch_shapes=[pltpu.VMEM((TB, D), jnp.float32)],
        ),
        compiler_params=pltpu.CompilerParams(
            dimension_semantics=("parallel", "arbitrary"),  # batch ∥, time serial
            vmem_limit_bytes=vmem_limit),
    )(proj, params["A"], params["ln_w"], params["ln_b"])

    if S_pad != S:
        states = states[:S]

    # ---- hoisted, batched output projection ----
    out = jnp.einsum("sbd,de->bse", states, W_out,
                     precision=projection_precision) + params["b_s2o"]
    return out.astype(x.dtype)


def reference_forward(x, params):
    """Plain-JAX reference with the ORIGINAL (unfused) op ordering."""
    B, S, E = x.shape
    D = params["A"].shape[0]

    def step(state, x_t):
        proj = jnp.dot(x_t, params["W_e2s"], precision=_HIGHEST) + params["b_e2s"][0]
        state = (jnp.dot(state, params["A"], precision=_HIGHEST)
                 + jnp.dot(proj, params["B_in"], precision=_HIGHEST))
        mean = jnp.mean(state, axis=-1, keepdims=True)
        var = jnp.mean((state - mean) ** 2, axis=-1, keepdims=True)
        state = (state - mean) / jnp.sqrt(var + LN_EPS)
        state = state * params["ln_w"][0] + params["ln_b"][0]
        y = jnp.dot(jnp.dot(state, params["C"], precision=_HIGHEST),
                    params["W_s2o"], precision=_HIGHEST) + params["b_s2o"][0]
        return state, y

    state0 = jnp.zeros((B, D), jnp.float32)
    _, ys = jax.lax.scan(step, state0, jnp.transpose(x, (1, 0, 2)))
    return jnp.transpose(ys, (1, 0, 2))


def xavier_uniform(key, shape):
    fan_in, fan_out = shape[0], shape[1]
    limit = jnp.sqrt(6.0 / (fan_in + fan_out))
    return jax.random.uniform(key, shape, jnp.float32, -limit, limit)


def make_params(key, emb, state_dim):
    ks = jax.random.split(key, 7)
    return {
        # nn.Linear(E, D): torch weight is (D, E); stored pre-transposed (E, D)
        "W_e2s": xavier_uniform(ks[0], (emb, state_dim)),
        "b_e2s": jax.random.uniform(ks[1], (1, state_dim), jnp.float32, -0.1, 0.1),
        "A": xavier_uniform(ks[2], (state_dim, state_dim)),       # global_state_control
        "B_in": xavier_uniform(ks[3], (state_dim, state_dim)),    # global_input_influence
        "C": xavier_uniform(ks[4], (state_dim, state_dim)),       # global_output_shaper
        "ln_w": jnp.ones((1, state_dim), jnp.float32),
        "ln_b": jnp.zeros((1, state_dim), jnp.float32),
        # nn.Linear(D, E): torch weight is (E, D); stored pre-transposed (D, E)
        "W_s2o": xavier_uniform(ks[5], (state_dim, emb)),
        "b_s2o": jax.random.uniform(ks[6], (1, emb), jnp.float32, -0.1, 0.1),
    }


if __name__ == "__main__":
    E, D = 32, 64  # embedding_dim, state_dim

    # Case 1: small spec-consistent shapes (single batch block, single chunk).
    B, S = 2, 8
    k_x, k_p = jax.random.split(jax.random.PRNGKey(0))
    x = jax.random.normal(k_x, (B, S, E), jnp.float32)
    params = make_params(k_p, E, D)

    out = jax.block_until_ready(
        attention_forward(x, params, projection_precision=_HIGHEST))
    ref = reference_forward(x, params)
    assert out.shape == (B, S, E)
    assert jnp.allclose(out, ref, atol=5e-4, rtol=5e-4), "mismatch vs reference (case 1)"

    # Case 2: exercises the parallel batch grid axis, batch-chunk interleave,
    # and partial unroll (B=32 -> TB=16 -> 2 grid batch blocks, 2 chunks).
    B2, S2 = 32, 20
    k_x2, k_p2 = jax.random.split(jax.random.PRNGKey(1))
    x2 = jax.random.normal(k_x2, (B2, S2, E), jnp.float32)
    params2 = make_params(k_p2, E, D)

    out2 = jax.block_until_ready(
        attention_forward(x2, params2, projection_precision=_HIGHEST))
    ref2 = reference_forward(x2, params2)
    assert out2.shape == (B2, S2, E)
    assert jnp.allclose(out2, ref2, atol=5e-4, rtol=5e-4), "mismatch vs reference (case 2)"

    print("KERNEL_OK")
</pallas_src>

<mosaic_0001>
module attributes {stable_mosaic.version = 11 : i64} {
  func.func @_recurrence_kernel(%arg0: i32, %arg1: i32, %arg2: memref<8x2x64xf32, #tpu.memory_space<vmem>>, %arg3: memref<64x64xf32, #tpu.memory_space<vmem>>, %arg4: memref<1x64xf32, #tpu.memory_space<vmem>>, %arg5: memref<1x64xf32, #tpu.memory_space<vmem>>, %arg6: memref<8x2x64xf32, #tpu.memory_space<vmem>>, %arg7: memref<2x64xf32, #tpu.memory_space<vmem>>) attributes {dimension_semantics = [#tpu.dimension_semantics<parallel>, #tpu.dimension_semantics<arbitrary>], iteration_bounds = array<i64: 1, 1>, scalar_prefetch = 0 : i64, scratch_operands = 1 : i64, tpu.core_type = #tpu.core_type<tc>, window_params = [{transform_indices = @transform_0, window_bounds = array<i64: 8, 2, 64>}, {pipeline_mode = #tpu.pipeline_mode<synchronous>, transform_indices = @transform_1, window_bounds = array<i64: 64, 64>}, {pipeline_mode = #tpu.pipeline_mode<synchronous>, transform_indices = @transform_2, window_bounds = array<i64: 1, 64>}, {pipeline_mode = #tpu.pipeline_mode<synchronous>, transform_indices = @transform_3, window_bounds = array<i64: 1, 64>}, {transform_indices = @transform_4, window_bounds = array<i64: 8, 2, 64>}]} {
    %c0_i32 = arith.constant 0 : i32
    %0 = arith.cmpi eq, %arg1, %c0_i32 : i32
    %1 = arith.extui %0 : i1 to i32
    %c0_i32_0 = arith.constant 0 : i32
    %2 = arith.cmpi ne, %1, %c0_i32_0 : i32
    scf.if %2 {
      %cst_90 = arith.constant 0.000000e+00 : f32
      %252 = vector.broadcast %cst_90 : f32 to vector<2x64xf32>
      %c0_91 = arith.constant 0 : index
      %c0_92 = arith.constant 0 : index
      %253 = vector.load %arg7[%c0_91, %c0_92] : memref<2x64xf32, #tpu.memory_space<vmem>>, vector<2x64xf32>
      tpu.vector_store %arg7[%c0_91, %c0_92], %252 {strides = array<i32>} : memref<2x64xf32, #tpu.memory_space<vmem>>, vector<2x64xf32>,
    } else {
    }
    %c0 = arith.constant 0 : index
    %c0_1 = arith.constant 0 : index
    %3 = vector.load %arg3[%c0, %c0_1] : memref<64x64xf32, #tpu.memory_space<vmem>>, vector<64x64xf32>
    %c0_2 = arith.constant 0 : index
    %c0_3 = arith.constant 0 : index
    %4 = vector.load %arg4[%c0_2, %c0_3] : memref<1x64xf32, #tpu.memory_space<vmem>>, vector<1x64xf32>
    %5 = vector.shape_cast %4 : vector<1x64xf32> to vector<1x64xf32>
    %6 = vector.broadcast %5 : vector<1x64xf32> to vector<2x64xf32>
    %c0_4 = arith.constant 0 : index
    %c0_5 = arith.constant 0 : index
    %7 = vector.load %arg5[%c0_4, %c0_5] : memref<1x64xf32, #tpu.memory_space<vmem>>, vector<1x64xf32>
    %8 = vector.shape_cast %7 : vector<1x64xf32> to vector<1x64xf32>
    %9 = vector.broadcast %8 : vector<1x64xf32> to vector<2x64xf32>
    %c0_6 = arith.constant 0 : index
    %c0_7 = arith.constant 0 : index
    %10 = vector.load %arg7[%c0_6, %c0_7] : memref<2x64xf32, #tpu.memory_space<vmem>>, vector<2x64xf32>
    %c0_i32_8 = arith.constant 0 : i32
    %11 = arith.index_cast %c0_i32_8 : i32 to index
    %c0_9 = arith.constant 0 : index
    %c0_10 = arith.constant 0 : index
    %12 = vector.load %arg2[%11, %c0_9, %c0_10] : memref<8x2x64xf32, #tpu.memory_space<vmem>>, vector<1x2x64xf32>
    %13 = vector.shape_cast %12 : vector<1x2x64xf32> to vector<2x64xf32>
    %cst = arith.constant dense<0.000000e+00> : vector<2x64xf32>
    %14 = tpu.matmul %10, %3, %cst {dimension_numbers = #tpu.dot_dimension_numbers<[1], [0], [0], [1], [0, 0, 1, 1], [], []>, precision = #tpu.contract_precision<fp32>} : vector<2x64xf32>, vector<64x64xf32>, vector<2x64xf32> -> vector<2x64xf32>
    %15 = arith.addf %14, %13 : vector<2x64xf32>
    %cst_11 = arith.constant dense<0.000000e+00> : vector<2xf32>
    %16 = vector.multi_reduction <add>, %15, %cst_11 [1] : vector<2x64xf32> to vector<2xf32>
    %17 = vector.shape_cast %16 : vector<2xf32> to vector<2x1xf32>
    %cst_12 = arith.constant 6.400000e+01 : f32
    %18 = vector.broadcast %cst_12 : f32 to vector<2x1xf32>
    %19 = arith.divf %17, %18 : vector<2x1xf32>
    %20 = arith.mulf %15, %15 : vector<2x64xf32>
    %cst_13 = arith.constant dense<0.000000e+00> : vector<2xf32>
    %21 = vector.multi_reduction <add>, %20, %cst_13 [1] : vector<2x64xf32> to vector<2xf32>
    %22 = vector.shape_cast %21 : vector<2xf32> to vector<2x1xf32>
    %cst_14 = arith.constant 6.400000e+01 : f32
    %23 = vector.broadcast %cst_14 : f32 to vector<2x1xf32>
    %24 = arith.divf %22, %23 : vector<2x1xf32>
    %25 = arith.mulf %19, %19 : vector<2x1xf32>
    %26 = arith.subf %24, %25 : vector<2x1xf32>
    %cst_15 = arith.constant 9.99999974E-6 : f32
    %27 = vector.broadcast %cst_15 : f32 to vector<2x1xf32>
    %28 = arith.addf %26, %27 : vector<2x1xf32>
    %29 = math.rsqrt %28 : vector<2x1xf32>
    %30 = vector.broadcast %29 : vector<2x1xf32> to vector<2x64xf32>
    %31 = arith.mulf %30, %6 : vector<2x64xf32>
    %32 = vector.broadcast %19 : vector<2x1xf32> to vector<2x64xf32>
    %33 = arith.mulf %32, %31 : vector<2x64xf32>
    %34 = arith.subf %9, %33 : vector<2x64xf32>
    %35 = arith.mulf %15, %31 : vector<2x64xf32>
    %36 = arith.addf %35, %34 : vector<2x64xf32>
    %37 = arith.index_cast %c0_i32_8 : i32 to index
    %c0_16 = arith.constant 0 : index
    %c0_17 = arith.constant 0 : index
    %38 = vector.load %arg6[%37, %c0_16, %c0_17] : memref<8x2x64xf32, #tpu.memory_space<vmem>>, vector<1x2x64xf32>
    %39 = vector.shape_cast %38 : vector<1x2x64xf32> to vector<2x64xf32>
    %40 = vector.shape_cast %36 : vector<2x64xf32> to vector<1x2x64xf32>
    tpu.vector_store %arg6[%37, %c0_16, %c0_17], %40 {strides = array<i32>} : memref<8x2x64xf32, #tpu.memory_space<vmem>>, vector<1x2x64xf32>,
    %c1_i32 = arith.constant 1 : i32
    %41 = arith.index_cast %c1_i32 : i32 to index
    %c0_18 = arith.constant 0 : index
    %c0_19 = arith.constant 0 : index
    %42 = vector.load %arg2[%41, %c0_18, %c0_19] : memref<8x2x64xf32, #tpu.memory_space<vmem>>, vector<1x2x64xf32>
    %43 = vector.shape_cast %42 : vector<1x2x64xf32> to vector<2x64xf32>
    %cst_20 = arith.constant dense<0.000000e+00> : vector<2x64xf32>
    %44 = tpu.matmul %36, %3, %cst_20 {dimension_numbers = #tpu.dot_dimension_numbers<[1], [0], [0], [1], [0, 0, 1, 1], [], []>, precision = #tpu.contract_precision<fp32>} : vector<2x64xf32>, vector<64x64xf32>, vector<2x64xf32> -> vector<2x64xf32>
    %45 = arith.addf %44, %43 : vector<2x64xf32>
    %cst_21 = arith.constant dense<0.000000e+00> : vector<2xf32>
    %46 = vector.multi_reduction <add>, %45, %cst_21 [1] : vector<2x64xf32> to vector<2xf32>
    %47 = vector.shape_cast %46 : vector<2xf32> to vector<2x1xf32>
    %cst_22 = arith.constant 6.400000e+01 : f32
    %48 = vector.broadcast %cst_22 : f32 to vector<2x1xf32>
    %49 = arith.divf %47, %48 : vector<2x1xf32>
    %50 = arith.mulf %45, %45 : vector<2x64xf32>
    %cst_23 = arith.constant dense<0.000000e+00> : vector<2xf32>
    %51 = vector.multi_reduction <add>, %50, %cst_23 [1] : vector<2x64xf32> to vector<2xf32>
    %52 = vector.shape_cast %51 : vector<2xf32> to vector<2x1xf32>
    %cst_24 = arith.constant 6.400000e+01 : f32
    %53 = vector.broadcast %cst_24 : f32 to vector<2x1xf32>
    %54 = arith.divf %52, %53 : vector<2x1xf32>
    %55 = arith.mulf %49, %49 : vector<2x1xf32>
    %56 = arith.subf %54, %55 : vector<2x1xf32>
    %cst_25 = arith.constant 9.99999974E-6 : f32
    %57 = vector.broadcast %cst_25 : f32 to vector<2x1xf32>
    %58 = arith.addf %56, %57 : vector<2x1xf32>
    %59 = math.rsqrt %58 : vector<2x1xf32>
    %60 = vector.broadcast %59 : vector<2x1xf32> to vector<2x64xf32>
    %61 = arith.mulf %60, %6 : vector<2x64xf32>
    %62 = vector.broadcast %49 : vector<2x1xf32> to vector<2x64xf32>
    %63 = arith.mulf %62, %61 : vector<2x64xf32>
    %64 = arith.subf %9, %63 : vector<2x64xf32>
    %65 = arith.mulf %45, %61 : vector<2x64xf32>
    %66 = arith.addf %65, %64 : vector<2x64xf32>
    %67 = arith.index_cast %c1_i32 : i32 to index
    %c0_26 = arith.constant 0 : index
    %c0_27 = arith.constant 0 : index
    %68 = vector.load %arg6[%67, %c0_26, %c0_27] : memref<8x2x64xf32, #tpu.memory_space<vmem>>, vector<1x2x64xf32>
    %69 = vector.shape_cast %68 : vector<1x2x64xf32> to vector<2x64xf32>
    %70 = vector.shape_cast %66 : vector<2x64xf32> to vector<1x2x64xf32>
    tpu.vector_store %arg6[%67, %c0_26, %c0_27], %70 {strides = array<i32>} : memref<8x2x64xf32, #tpu.memory_space<vmem>>, vector<1x2x64xf32>,
    %c2_i32 = arith.constant 2 : i32
    %71 = arith.index_cast %c2_i32 : i32 to index
    %c0_28 = arith.constant 0 : index
    %c0_29 = arith.constant 0 : index
    %72 = vector.load %arg2[%71, %c0_28, %c0_29] : memref<8x2x64xf32, #tpu.memory_space<vmem>>, vector<1x2x64xf32>
    %73 = vector.shape_cast %72 : vector<1x2x64xf32> to vector<2x64xf32>
    %cst_30 = arith.constant dense<0.000000e+00> : vector<2x64xf32>
    %74 = tpu.matmul %66, %3, %cst_30 {dimension_numbers = #tpu.dot_dimension_numbers<[1], [0], [0], [1], [0, 0, 1, 1], [], []>, precision = #tpu.contract_precision<fp32>} : vector<2x64xf32>, vector<64x64xf32>, vector<2x64xf32> -> vector<2x64xf32>
    %75 = arith.addf %74, %73 : vector<2x64xf32>
    %cst_31 = arith.constant dense<0.000000e+00> : vector<2xf32>
    %76 = vector.multi_reduction <add>, %75, %cst_31 [1] : vector<2x64xf32> to vector<2xf32>
    %77 = vector.shape_cast %76 : vector<2xf32> to vector<2x1xf32>
    %cst_32 = arith.constant 6.400000e+01 : f32
    %78 = vector.broadcast %cst_32 : f32 to vector<2x1xf32>
    %79 = arith.divf %77, %78 : vector<2x1xf32>
    %80 = arith.mulf %75, %75 : vector<2x64xf32>
    %cst_33 = arith.constant dense<0.000000e+00> : vector<2xf32>
    %81 = vector.multi_reduction <add>, %80, %cst_33 [1] : vector<2x64xf32> to vector<2xf32>
    %82 = vector.shape_cast %81 : vector<2xf32> to vector<2x1xf32>
    %cst_34 = arith.constant 6.400000e+01 : f32
    %83 = vector.broadcast %cst_34 : f32 to vector<2x1xf32>
    %84 = arith.divf %82, %83 : vector<2x1xf32>
    %85 = arith.mulf %79, %79 : vector<2x1xf32>
    %86 = arith.subf %84, %85 : vector<2x1xf32>
    %cst_35 = arith.constant 9.99999974E-6 : f32
    %87 = vector.broadcast %cst_35 : f32 to vector<2x1xf32>
    %88 = arith.addf %86, %87 : vector<2x1xf32>
    %89 = math.rsqrt %88 : vector<2x1xf32>
    %90 = vector.broadcast %89 : vector<2x1xf32> to vector<2x64xf32>
    %91 = arith.mulf %90, %6 : vector<2x64xf32>
    %92 = vector.broadcast %79 : vector<2x1xf32> to vector<2x64xf32>
    %93 = arith.mulf %92, %91 : vector<2x64xf32>
    %94 = arith.subf %9, %93 : vector<2x64xf32>
    %95 = arith.mulf %75, %91 : vector<2x64xf32>
    %96 = arith.addf %95, %94 : vector<2x64xf32>
    %97 = arith.index_cast %c2_i32 : i32 to index
    %c0_36 = arith.constant 0 : index
    %c0_37 = arith.constant 0 : index
    %98 = vector.load %arg6[%97, %c0_36, %c0_37] : memref<8x2x64xf32, #tpu.memory_space<vmem>>, vector<1x2x64xf32>
    %99 = vector.shape_cast %98 : vector<1x2x64xf32> to vector<2x64xf32>
    %100 = vector.shape_cast %96 : vector<2x64xf32> to vector<1x2x64xf32>
    tpu.vector_store %arg6[%97, %c0_36, %c0_37], %100 {strides = array<i32>} : memref<8x2x64xf32, #tpu.memory_space<vmem>>, vector<1x2x64xf32>,
    %c3_i32 = arith.constant 3 : i32
    %101 = arith.index_cast %c3_i32 : i32 to index
    %c0_38 = arith.constant 0 : index
    %c0_39 = arith.constant 0 : index
    %102 = vector.load %arg2[%101, %c0_38, %c0_39] : memref<8x2x64xf32, #tpu.memory_space<vmem>>, vector<1x2x64xf32>
    %103 = vector.shape_cast %102 : vector<1x2x64xf32> to vector<2x64xf32>
    %cst_40 = arith.constant dense<0.000000e+00> : vector<2x64xf32>
    %104 = tpu.matmul %96, %3, %cst_40 {dimension_numbers = #tpu.dot_dimension_numbers<[1], [0], [0], [1], [0, 0, 1, 1], [], []>, precision = #tpu.contract_precision<fp32>} : vector<2x64xf32>, vector<64x64xf32>, vector<2x64xf32> -> vector<2x64xf32>
    %105 = arith.addf %104, %103 : vector<2x64xf32>
    %cst_41 = arith.constant dense<0.000000e+00> : vector<2xf32>
    %106 = vector.multi_reduction <add>, %105, %cst_41 [1] : vector<2x64xf32> to vector<2xf32>
    %107 = vector.shape_cast %106 : vector<2xf32> to vector<2x1xf32>
    %cst_42 = arith.constant 6.400000e+01 : f32
    %108 = vector.broadcast %cst_42 : f32 to vector<2x1xf32>
    %109 = arith.divf %107, %108 : vector<2x1xf32>
    %110 = arith.mulf %105, %105 : vector<2x64xf32>
    %cst_43 = arith.constant dense<0.000000e+00> : vector<2xf32>
    %111 = vector.multi_reduction <add>, %110, %cst_43 [1] : vector<2x64xf32> to vector<2xf32>
    %112 = vector.shape_cast %111 : vector<2xf32> to vector<2x1xf32>
    %cst_44 = arith.constant 6.400000e+01 : f32
    %113 = vector.broadcast %cst_44 : f32 to vector<2x1xf32>
    %114 = arith.divf %112, %113 : vector<2x1xf32>
    %115 = arith.mulf %109, %109 : vector<2x1xf32>
    %116 = arith.subf %114, %115 : vector<2x1xf32>
    %cst_45 = arith.constant 9.99999974E-6 : f32
    %117 = vector.broadcast %cst_45 : f32 to vector<2x1xf32>
    %118 = arith.addf %116, %117 : vector<2x1xf32>
    %119 = math.rsqrt %118 : vector<2x1xf32>
    %120 = vector.broadcast %119 : vector<2x1xf32> to vector<2x64xf32>
    %121 = arith.mulf %120, %6 : vector<2x64xf32>
    %122 = vector.broadcast %109 : vector<2x1xf32> to vector<2x64xf32>
    %123 = arith.mulf %122, %121 : vector<2x64xf32>
    %124 = arith.subf %9, %123 : vector<2x64xf32>
    %125 = arith.mulf %105, %121 : vector<2x64xf32>
    %126 = arith.addf %125, %124 : vector<2x64xf32>
    %127 = arith.index_cast %c3_i32 : i32 to index
    %c0_46 = arith.constant 0 : index
    %c0_47 = arith.constant 0 : index
    %128 = vector.load %arg6[%127, %c0_46, %c0_47] : memref<8x2x64xf32, #tpu.memory_space<vmem>>, vector<1x2x64xf32>
    %129 = vector.shape_cast %128 : vector<1x2x64xf32> to vector<2x64xf32>
    %130 = vector.shape_cast %126 : vector<2x64xf32> to vector<1x2x64xf32>
    tpu.vector_store %arg6[%127, %c0_46, %c0_47], %130 {strides = array<i32>} : memref<8x2x64xf32, #tpu.memory_space<vmem>>, vector<1x2x64xf32>,
    %c4_i32 = arith.constant 4 : i32
    %131 = arith.index_cast %c4_i32 : i32 to index
    %c0_48 = arith.constant 0 : index
    %c0_49 = arith.constant 0 : index
    %132 = vector.load %arg2[%131, %c0_48, %c0_49] : memref<8x2x64xf32, #tpu.memory_space<vmem>>, vector<1x2x64xf32>
    %133 = vector.shape_cast %132 : vector<1x2x64xf32> to vector<2x64xf32>
    %cst_50 = arith.constant dense<0.000000e+00> : vector<2x64xf32>
    %134 = tpu.matmul %126, %3, %cst_50 {dimension_numbers = #tpu.dot_dimension_numbers<[1], [0], [0], [1], [0, 0, 1, 1], [], []>, precision = #tpu.contract_precision<fp32>} : vector<2x64xf32>, vector<64x64xf32>, vector<2x64xf32> -> vector<2x64xf32>
    %135 = arith.addf %134, %133 : vector<2x64xf32>
    %cst_51 = arith.constant dense<0.000000e+00> : vector<2xf32>
    %136 = vector.multi_reduction <add>, %135, %cst_51 [1] : vector<2x64xf32> to vector<2xf32>
    %137 = vector.shape_cast %136 : vector<2xf32> to vector<2x1xf32>
    %cst_52 = arith.constant 6.400000e+01 : f32
    %138 = vector.broadcast %cst_52 : f32 to vector<2x1xf32>
    %139 = arith.divf %137, %138 : vector<2x1xf32>
    %140 = arith.mulf %135, %135 : vector<2x64xf32>
    %cst_53 = arith.constant dense<0.000000e+00> : vector<2xf32>
    %141 = vector.multi_reduction <add>, %140, %cst_53 [1] : vector<2x64xf32> to vector<2xf32>
    %142 = vector.shape_cast %141 : vector<2xf32> to vector<2x1xf32>
    %cst_54 = arith.constant 6.400000e+01 : f32
    %143 = vector.broadcast %cst_54 : f32 to vector<2x1xf32>
    %144 = arith.divf %142, %143 : vector<2x1xf32>
    %145 = arith.mulf %139, %139 : vector<2x1xf32>
    %146 = arith.subf %144, %145 : vector<2x1xf32>
    %cst_55 = arith.constant 9.99999974E-6 : f32
    %147 = vector.broadcast %cst_55 : f32 to vector<2x1xf32>
    %148 = arith.addf %146, %147 : vector<2x1xf32>
    %149 = math.rsqrt %148 : vector<2x1xf32>
    %150 = vector.broadcast %149 : vector<2x1xf32> to vector<2x64xf32>
    %151 = arith.mulf %150, %6 : vector<2x64xf32>
    %152 = vector.broadcast %139 : vector<2x1xf32> to vector<2x64xf32>
    %153 = arith.mulf %152, %151 : vector<2x64xf32>
    %154 = arith.subf %9, %153 : vector<2x64xf32>
    %155 = arith.mulf %135, %151 : vector<2x64xf32>
    %156 = arith.addf %155, %154 : vector<2x64xf32>
    %157 = arith.index_cast %c4_i32 : i32 to index
    %c0_56 = arith.constant 0 : index
    %c0_57 = arith.constant 0 : index
    %158 = vector.load %arg6[%157, %c0_56, %c0_57] : memref<8x2x64xf32, #tpu.memory_space<vmem>>, vector<1x2x64xf32>
    %159 = vector.shape_cast %158 : vector<1x2x64xf32> to vector<2x64xf32>
    %160 = vector.shape_cast %156 : vector<2x64xf32> to vector<1x2x64xf32>
    tpu.vector_store %arg6[%157, %c0_56, %c0_57], %160 {strides = array<i32>} : memref<8x2x64xf32, #tpu.memory_space<vmem>>, vector<1x2x64xf32>,
    %c5_i32 = arith.constant 5 : i32
    %161 = arith.index_cast %c5_i32 : i32 to index
    %c0_58 = arith.constant 0 : index
    %c0_59 = arith.constant 0 : index
    %162 = vector.load %arg2[%161, %c0_58, %c0_59] : memref<8x2x64xf32, #tpu.memory_space<vmem>>, vector<1x2x64xf32>
    %163 = vector.shape_cast %162 : vector<1x2x64xf32> to vector<2x64xf32>
    %cst_60 = arith.constant dense<0.000000e+00> : vector<2x64xf32>
    %164 = tpu.matmul %156, %3, %cst_60 {dimension_numbers = #tpu.dot_dimension_numbers<[1], [0], [0], [1], [0, 0, 1, 1], [], []>, precision = #tpu.contract_precision<fp32>} : vector<2x64xf32>, vector<64x64xf32>, vector<2x64xf32> -> vector<2x64xf32>
    %165 = arith.addf %164, %163 : vector<2x64xf32>
    %cst_61 = arith.constant dense<0.000000e+00> : vector<2xf32>
    %166 = vector.multi_reduction <add>, %165, %cst_61 [1] : vector<2x64xf32> to vector<2xf32>
    %167 = vector.shape_cast %166 : vector<2xf32> to vector<2x1xf32>
    %cst_62 = arith.constant 6.400000e+01 : f32
    %168 = vector.broadcast %cst_62 : f32 to vector<2x1xf32>
    %169 = arith.divf %167, %168 : vector<2x1xf32>
    %170 = arith.mulf %165, %165 : vector<2x64xf32>
    %cst_63 = arith.constant dense<0.000000e+00> : vector<2xf32>
    %171 = vector.multi_reduction <add>, %170, %cst_63 [1] : vector<2x64xf32> to vector<2xf32>
    %172 = vector.shape_cast %171 : vector<2xf32> to vector<2x1xf32>
    %cst_64 = arith.constant 6.400000e+01 : f32
    %173 = vector.broadcast %cst_64 : f32 to vector<2x1xf32>
    %174 = arith.divf %172, %173 : vector<2x1xf32>
    %175 = arith.mulf %169, %169 : vector<2x1xf32>
    %176 = arith.subf %174, %175 : vector<2x1xf32>
    %cst_65 = arith.constant 9.99999974E-6 : f32
    %177 = vector.broadcast %cst_65 : f32 to vector<2x1xf32>
    %178 = arith.addf %176, %177 : vector<2x1xf32>
    %179 = math.rsqrt %178 : vector<2x1xf32>
    %180 = vector.broadcast %179 : vector<2x1xf32> to vector<2x64xf32>
    %181 = arith.mulf %180, %6 : vector<2x64xf32>
    %182 = vector.broadcast %169 : vector<2x1xf32> to vector<2x64xf32>
    %183 = arith.mulf %182, %181 : vector<2x64xf32>
    %184 = arith.subf %9, %183 : vector<2x64xf32>
    %185 = arith.mulf %165, %181 : vector<2x64xf32>
    %186 = arith.addf %185, %184 : vector<2x64xf32>
    %187 = arith.index_cast %c5_i32 : i32 to index
    %c0_66 = arith.constant 0 : index
    %c0_67 = arith.constant 0 : index
    %188 = vector.load %arg6[%187, %c0_66, %c0_67] : memref<8x2x64xf32, #tpu.memory_space<vmem>>, vector<1x2x64xf32>
    %189 = vector.shape_cast %188 : vector<1x2x64xf32> to vector<2x64xf32>
    %190 = vector.shape_cast %186 : vector<2x64xf32> to vector<1x2x64xf32>
    tpu.vector_store %arg6[%187, %c0_66, %c0_67], %190 {strides = array<i32>} : memref<8x2x64xf32, #tpu.memory_space<vmem>>, vector<1x2x64xf32>,
    %c6_i32 = arith.constant 6 : i32
    %191 = arith.index_cast %c6_i32 : i32 to index
    %c0_68 = arith.constant 0 : index
    %c0_69 = arith.constant 0 : index
    %192 = vector.load %arg2[%191, %c0_68, %c0_69] : memref<8x2x64xf32, #tpu.memory_space<vmem>>, vector<1x2x64xf32>
    %193 = vector.shape_cast %192 : vector<1x2x64xf32> to vector<2x64xf32>
    %cst_70 = arith.constant dense<0.000000e+00> : vector<2x64xf32>
    %194 = tpu.matmul %186, %3, %cst_70 {dimension_numbers = #tpu.dot_dimension_numbers<[1], [0], [0], [1], [0, 0, 1, 1], [], []>, precision = #tpu.contract_precision<fp32>} : vector<2x64xf32>, vector<64x64xf32>, vector<2x64xf32> -> vector<2x64xf32>
    %195 = arith.addf %194, %193 : vector<2x64xf32>
    %cst_71 = arith.constant dense<0.000000e+00> : vector<2xf32>
    %196 = vector.multi_reduction <add>, %195, %cst_71 [1] : vector<2x64xf32> to vector<2xf32>
    %197 = vector.shape_cast %196 : vector<2xf32> to vector<2x1xf32>
    %cst_72 = arith.constant 6.400000e+01 : f32
    %198 = vector.broadcast %cst_72 : f32 to vector<2x1xf32>
    %199 = arith.divf %197, %198 : vector<2x1xf32>
    %200 = arith.mulf %195, %195 : vector<2x64xf32>
    %cst_73 = arith.constant dense<0.000000e+00> : vector<2xf32>
    %201 = vector.multi_reduction <add>, %200, %cst_73 [1] : vector<2x64xf32> to vector<2xf32>
    %202 = vector.shape_cast %201 : vector<2xf32> to vector<2x1xf32>
    %cst_74 = arith.constant 6.400000e+01 : f32
    %203 = vector.broadcast %cst_74 : f32 to vector<2x1xf32>
    %204 = arith.divf %202, %203 : vector<2x1xf32>
    %205 = arith.mulf %199, %199 : vector<2x1xf32>
    %206 = arith.subf %204, %205 : vector<2x1xf32>
    %cst_75 = arith.constant 9.99999974E-6 : f32
    %207 = vector.broadcast %cst_75 : f32 to vector<2x1xf32>
    %208 = arith.addf %206, %207 : vector<2x1xf32>
    %209 = math.rsqrt %208 : vector<2x1xf32>
    %210 = vector.broadcast %209 : vector<2x1xf32> to vector<2x64xf32>
    %211 = arith.mulf %210, %6 : vector<2x64xf32>
    %212 = vector.broadcast %199 : vector<2x1xf32> to vector<2x64xf32>
    %213 = arith.mulf %212, %211 : vector<2x64xf32>
    %214 = arith.subf %9, %213 : vector<2x64xf32>
    %215 = arith.mulf %195, %211 : vector<2x64xf32>
    %216 = arith.addf %215, %214 : vector<2x64xf32>
    %217 = arith.index_cast %c6_i32 : i32 to index
    %c0_76 = arith.constant 0 : index
    %c0_77 = arith.constant 0 : index
    %218 = vector.load %arg6[%217, %c0_76, %c0_77] : memref<8x2x64xf32, #tpu.memory_space<vmem>>, vector<1x2x64xf32>
    %219 = vector.shape_cast %218 : vector<1x2x64xf32> to vector<2x64xf32>
    %220 = vector.shape_cast %216 : vector<2x64xf32> to vector<1x2x64xf32>
    tpu.vector_store %arg6[%217, %c0_76, %c0_77], %220 {strides = array<i32>} : memref<8x2x64xf32, #tpu.memory_space<vmem>>, vector<1x2x64xf32>,
    %c7_i32 = arith.constant 7 : i32
    %221 = arith.index_cast %c7_i32 : i32 to index
    %c0_78 = arith.constant 0 : index
    %c0_79 = arith.constant 0 : index
    %222 = vector.load %arg2[%221, %c0_78, %c0_79] : memref<8x2x64xf32, #tpu.memory_space<vmem>>, vector<1x2x64xf32>
    %223 = vector.shape_cast %222 : vector<1x2x64xf32> to vector<2x64xf32>
    %cst_80 = arith.constant dense<0.000000e+00> : vector<2x64xf32>
    %224 = tpu.matmul %216, %3, %cst_80 {dimension_numbers = #tpu.dot_dimension_numbers<[1], [0], [0], [1], [0, 0, 1, 1], [], []>, precision = #tpu.contract_precision<fp32>} : vector<2x64xf32>, vector<64x64xf32>, vector<2x64xf32> -> vector<2x64xf32>
    %225 = arith.addf %224, %223 : vector<2x64xf32>
    %cst_81 = arith.constant dense<0.000000e+00> : vector<2xf32>
    %226 = vector.multi_reduction <add>, %225, %cst_81 [1] : vector<2x64xf32> to vector<2xf32>
    %227 = vector.shape_cast %226 : vector<2xf32> to vector<2x1xf32>
    %cst_82 = arith.constant 6.400000e+01 : f32
    %228 = vector.broadcast %cst_82 : f32 to vector<2x1xf32>
    %229 = arith.divf %227, %228 : vector<2x1xf32>
    %230 = arith.mulf %225, %225 : vector<2x64xf32>
    %cst_83 = arith.constant dense<0.000000e+00> : vector<2xf32>
    %231 = vector.multi_reduction <add>, %230, %cst_83 [1] : vector<2x64xf32> to vector<2xf32>
    %232 = vector.shape_cast %231 : vector<2xf32> to vector<2x1xf32>
    %cst_84 = arith.constant 6.400000e+01 : f32
    %233 = vector.broadcast %cst_84 : f32 to vector<2x1xf32>
    %234 = arith.divf %232, %233 : vector<2x1xf32>
    %235 = arith.mulf %229, %229 : vector<2x1xf32>
    %236 = arith.subf %234, %235 : vector<2x1xf32>
    %cst_85 = arith.constant 9.99999974E-6 : f32
    %237 = vector.broadcast %cst_85 : f32 to vector<2x1xf32>
    %238 = arith.addf %236, %237 : vector<2x1xf32>
    %239 = math.rsqrt %238 : vector<2x1xf32>
    %240 = vector.broadcast %239 : vector<2x1xf32> to vector<2x64xf32>
    %241 = arith.mulf %240, %6 : vector<2x64xf32>
    %242 = vector.broadcast %229 : vector<2x1xf32> to vector<2x64xf32>
    %243 = arith.mulf %242, %241 : vector<2x64xf32>
    %244 = arith.subf %9, %243 : vector<2x64xf32>
    %245 = arith.mulf %225, %241 : vector<2x64xf32>
    %246 = arith.addf %245, %244 : vector<2x64xf32>
    %247 = arith.index_cast %c7_i32 : i32 to index
    %c0_86 = arith.constant 0 : index
    %c0_87 = arith.constant 0 : index
    %248 = vector.load %arg6[%247, %c0_86, %c0_87] : memref<8x2x64xf32, #tpu.memory_space<vmem>>, vector<1x2x64xf32>
    %249 = vector.shape_cast %248 : vector<1x2x64xf32> to vector<2x64xf32>
    %250 = vector.shape_cast %246 : vector<2x64xf32> to vector<1x2x64xf32>
    tpu.vector_store %arg6[%247, %c0_86, %c0_87], %250 {strides = array<i32>} : memref<8x2x64xf32, #tpu.memory_space<vmem>>, vector<1x2x64xf32>,
    %c8_i32 = arith.constant 8 : i32
    %c0_88 = arith.constant 0 : index
    %c0_89 = arith.constant 0 : index
    %251 = vector.load %arg7[%c0_88, %c0_89] : memref<2x64xf32, #tpu.memory_space<vmem>>, vector<2x64xf32>
    tpu.vector_store %arg7[%c0_88, %c0_89], %246 {strides = array<i32>} : memref<2x64xf32, #tpu.memory_space<vmem>>, vector<2x64xf32>,
    return
  }
  func.func @transform_0(%arg0: i32, %arg1: i32) -> (i32, i32, i32) {
    %c0_i32 = arith.constant 0 : i32
    %c0_i32_0 = arith.constant 0 : i32
    return %arg1, %arg0, %c0_i32 : i32, i32, i32
  }
  func.func @transform_1(%arg0: i32, %arg1: i32) -> (i32, i32) {
    %c0_i32 = arith.constant 0 : i32
    %c0_i32_0 = arith.constant 0 : i32
    %c0_i32_1 = arith.constant 0 : i32
    return %c0_i32, %c0_i32_0 : i32, i32
  }
  func.func @transform_2(%arg0: i32, %arg1: i32) -> (i32, i32) {
    %c0_i32 = arith.constant 0 : i32
    %c0_i32_0 = arith.constant 0 : i32
    %c0_i32_1 = arith.constant 0 : i32
    return %c0_i32, %c0_i32_0 : i32, i32
  }
  func.func @transform_3(%arg0: i32, %arg1: i32) -> (i32, i32) {
    %c0_i32 = arith.constant 0 : i32
    %c0_i32_0 = arith.constant 0 : i32
    %c0_i32_1 = arith.constant 0 : i32
    return %c0_i32, %c0_i32_0 : i32, i32
  }
  func.func @transform_4(%arg0: i32, %arg1: i32) -> (i32, i32, i32) {
    %c0_i32 = arith.constant 0 : i32
    %c0_i32_0 = arith.constant 0 : i32
    return %arg1, %arg0, %c0_i32 : i32, i32, i32
  }
}

</mosaic_0001>

<bundles_post_ra>
// kernel: tpu_custom_call.1
= control target key start
LH: loop header
LB: loop body
LE: loop exit
PB: predicated region body
PF: predicated region fallthrough
CT: control target
= control target key end

     0   :  { %9 = vsyncpa [#allocation4], 0  ;;  %s7440_s0 = inlined_call_operand.hbm [shape: f32[8,2,64], index: 0, kind: input, shape index: {}]   ;;  %s7441_s1 = inlined_call_operand.hbm [shape: f32[64,64], index: 1, kind: input, shape index: {}]   ;;  %s7442_s2 = inlined_call_operand.vmem [shape: f32[1,64], index: 2, kind: input, shape index: {}]   ;;  %s7443_s3 = inlined_call_operand.vmem [shape: f32[1,64], index: 3, kind: input, shape index: {}]   ;;  %s7444_s4 = inlined_call_operand.hbm [shape: f32[8,2,64], index: 4, kind: output, shape index: {}]  }
   0x1   :  { %10 = vsyncpa [#allocation7], 0 }
   0x2   :  { %11 = vsyncpa [#allocation5], 0  ;;  %s6701_s15 = smov [#allocation3]   ;;  %s6629_s19 = scalar_lea.hbm %s7440_s0, 256 }
   0x3   :  { %s17_s16 = sshll.u32 %s6701_s15, 4  ;;  %p6630_p0 = scmp.ne.s32.totalorder %s7440_s0, %s6629_s19  ;;  %s18_s16 = int_to_ptr.vmem [resolvable:$true] %s17_s16 }
   0x4   :  { %p6633_p1 = scmp.lt.u32.totalorder %s6629_s19, %s7440_s0 }
   0x6   :  { %p6635_p2 = pnand %p6633_p1, %p6630_p0 }
   0x8   :  { %6638 = shalt.err (!%p6635_p2)
}
   0x9   :  { %s6639_s24 = scalar_lea.vmem %s18_s16, 256  ;;  %p6644_p4 = scmp.lt.s32.totalorder %s18_s16, %s18_s16 }
   0xa   :  { %p6640_p3 = scmp.ne.s32.totalorder %s18_s16, %s6639_s24  ;;  %p6645_p5 = scmp.lt.s32.totalorder %s6639_s24, %s6639_s24 }
   0xc   :  { %p6646_p6 = por %p6645_p5, %p6644_p4 }
   0xe   :  { %p6647_p7 = pnand %p6646_p6, %p6640_p3 }
  0x10   :  { %6650 = shalt.err (!%p6647_p7)
}
  0x11   :  { %s6702_s25 = smov 32   ;;  %s6703_s26 = smov 2  }
  0x12   :  { %23 = dma.hbm_to_vmem [thread:$0]  %s7440_s0, 256, %s18_s16, [#allocation4], %s6702_s25, %s6702_s25, %s6703_s26  }
  0x13   :  { %s6704_s29 = smov [#allocation6]   ;;  %s6651_s7 = scalar_lea.hbm %s7441_s1, 1024 }
  0x14   :  { %s29_s30 = sshll.u32 %s6704_s29, 4  ;;  %p6652_p8 = scmp.ne.s32.totalorder %s7441_s1, %s6651_s7  ;;  %s30_s30 = int_to_ptr.vmem [resolvable:$true] %s29_s30 }
  0x15   :  { %p6655_p9 = scmp.lt.u32.totalorder %s6651_s7, %s7441_s1 }
  0x17   :  { %p6657_p10 = pnand %p6655_p9, %p6652_p8 }
  0x19   :  { %6660 = shalt.err (!%p6657_p10)
}
  0x1a   :  { %s6661_s12 = scalar_lea.vmem %s30_s30, 1024  ;;  %p6666_p12 = scmp.lt.s32.totalorder %s30_s30, %s30_s30 }
  0x1b   :  { %p6662_p11 = scmp.ne.s32.totalorder %s30_s30, %s6661_s12  ;;  %p6667_p13 = scmp.lt.s32.totalorder %s6661_s12, %s6661_s12 }
  0x1d   :  { %p6668_p0 = por %p6667_p13, %p6666_p12 }
  0x1f   :  { %p6669_p1 = pnand %p6668_p0, %p6662_p11 }
  0x21   :  { %6672 = shalt.err (!%p6669_p1)
}
  0x22   :  { %s6705_s0 = smov 128   ;;  %s6706_s13 = smov 8  }
  0x23   :  { %35 = dma.hbm_to_vmem [thread:$0]  %s7441_s1, 1024, %s30_s30, [#allocation7], %s6705_s0, %s6705_s0, %s6706_s13  }
  0x24   :  { %6695 = dma.done.wait [#allocation4], 256  }
  0x25   :  { %6696 = vsyncadd [#allocation4], 4294967040 }
  0x26   :  { %6697 = dma.done.wait [#allocation7], 1024  }
  0x27   :  { %6698 = vsyncadd [#allocation7], 4294966272  ;;  %vm50_vm0 = vcmask 517120   ;;  %v6707_v0 = vmov 0.0|0.0   ;;  %vm6708_vm1 = vmmov 0   ;;  %v6709_v1 = vmov 0.0  }
  0x28   :  { %5937 = vmatprep.subr.bf16.mxu0 %v6707_v0  ;;  %5041 = vmatprep.mubr.msk.f32.mxu0 %vm6708_vm1, %v6709_v1  ;;  %51 = vst.msk [vmem:[#allocation2] sm:$0x3] %vm50_vm0, %v6709_v1  ;;  %v52_v2 = vld [vmem:[#allocation6] sm:$0xff]  ;;  %v53_v3 = vld [vmem:[#allocation6 + $0x8] sm:$0xff]  ;;  %v54_v4 = vld [vmem:[#allocation6 + $0x10] sm:$0xff]  ;;  %vm76_vm2 = vcmask 523264  }
  0x29   :  { %6009 = vmatprep.subr.bf16.mxu1 %v6707_v0  ;;  %5155 = vmatprep.mubr.msk.f32.mxu1 %vm6708_vm1, %v6709_v1  ;;  %v81_v5 = vand.u32 4294901760, %v52_v2  ;;  %v84_v6 = vand.u32 4294901760, %v53_v3  ;;  %v55_v7 = vld [vmem:[#allocation6 + $0x18] sm:$0xff]  ;;  %v87_v8 = vand.u32 4294901760, %v54_v4  ;;  %v56_v9 = vld [vmem:[#allocation6 + $0x20] sm:$0xff]  ;;  %v57_v10 = vld [vmem:[#allocation6 + $0x28] sm:$0xff] }
  0x2a   :  { %v90_v11 = vand.u32 4294901760, %v55_v7  ;;  %v93_v15 = vand.u32 4294901760, %v56_v9  ;;  %v96_v16 = vand.u32 4294901760, %v57_v10  ;;  %v58_v17 = vld [vmem:[#allocation6 + $0x30] sm:$0xff]  ;;  %v59_v18 = vld [vmem:[#allocation6 + $0x38] sm:$0xff] }
  0x2b   :  { %v6771_v12 = vpack.c.bf16 %v84_v6, %v81_v5  ;;  %v6773_v14 = vsub.f32 %v52_v2, %v81_v5  ;;  %v6776_v20 = vsub.f32 %v53_v3, %v84_v6  ;;  %v6784_v24 = vsub.f32 %v54_v4, %v87_v8 }
  0x2c   :  { %v6779_v21 = vpack.c.bf16 %v90_v11, %v87_v8  ;;  %v6789_v26 = vsub.f32 %v55_v7, %v90_v11  ;;  %v99_v27 = vand.u32 4294901760, %v58_v17  ;;  %v102_v28 = vand.u32 4294901760, %v59_v18  ;;  %v75_v11 = vld [vmem:[#allocation3] sm:$0x3] }
  0x2d   :  { %5939 = vmatpush3.bf16.msra.mxu0 %v6771_v12  ;;  %v166_v23 = vand.u32 4294901760, %v6773_v14  ;;  %6011 = vmatpush3.bf16.msra.mxu1 %v6771_v12  ;;  %v173_v25 = vand.u32 4294901760, %v6776_v20  ;;  %v6795_v30 = vpack.c.bf16 %v96_v16, %v93_v15  ;;  %v6800_v32 = vsub.f32 %v56_v9, %v93_v15 }
  0x2e   :  { %5940 = vmatprep.subr.bf16.mxu0 %v6707_v0  ;;  %6012 = vmatprep.subr.bf16.mxu1 %v6707_v0  ;;  %v6802_v33 = vsub.f32 %v57_v10, %v96_v16  ;;  %v180_v36 = vand.u32 4294901760, %v6784_v24  ;;  %v187_v37 = vand.u32 4294901760, %v6789_v26  ;;  %v6814_v38 = vpack.c.bf16 %v102_v28, %v99_v27 }
  0x2f   :  { %v74_v13 = vld [vmem:[#allocation2] sm:$0x3]  ;;  %v167_v31 = vsub.f32 %v6773_v14, %v166_v23  ;;  %v174_v35 = vsub.f32 %v6776_v20, %v173_v25  ;;  %v6816_v39 = vsub.f32 %v58_v17, %v99_v27  ;;  %v194_v42 = vand.u32 4294901760, %v6800_v32 }
  0x30   :  { %v78_v19 = vsel %vm76_vm2, %v74_v13, 0  ;;  %v201_v43 = vand.u32 4294901760, %v6802_v33  ;;  %v181_v45 = vsub.f32 %v6784_v24, %v180_v36  ;;  %v188_v46 = vsub.f32 %v6789_v26, %v187_v37  ;;  %v6964_v27 = vld [vmem:[%s7442_s2] ss:$0 sm:$0xff] }
  0x31   :  { %v6781_v22 = vand.u32 4294901760, %v78_v19  ;;  %5942 = vmatpush3.bf16.msra.mxu0 %v6779_v21  ;;  %6014 = vmatpush3.bf16.msra.mxu1 %v6779_v21  ;;  %v168_v41 = vand.u32 4294901760, %v167_v31  ;;  %v175_v44 = vand.u32 4294901760, %v174_v35  ;;  %v6830_v47 = vsub.f32 %v59_v18, %v102_v28  ;;  %v6970_v31 = vld [vmem:[%s7443_s3] ss:$0 sm:$0xff] }
  0x32   :  { %5943 = vmatprep.subr.bf16.mxu0 %v6707_v0  ;;  %6015 = vmatprep.subr.bf16.mxu1 %v6707_v0  ;;  %v195_v49 = vsub.f32 %v6800_v32, %v194_v42  ;;  %v202_v50 = vsub.f32 %v6802_v33, %v201_v43  ;;  %v208_v51 = vand.u32 4294901760, %v6816_v39  ;;  %v182_v53 = vand.u32 4294901760, %v181_v45 }
  0x33   :  { %v6793_v29 = vsub.f32 %v78_v19, %v6781_v22  ;;  %v6843_v52 = vpack.c.bf16 %v175_v44, %v168_v41  ;;  %v189_v54 = vand.u32 4294901760, %v188_v46  ;;  %v215_v55 = vand.u32 4294901760, %v6830_v47 }
  0x34   :  { %v209_v56 = vsub.f32 %v6816_v39, %v208_v51  ;;  %v196_v58 = vand.u32 4294901760, %v195_v49  ;;  %v203_v59 = vand.u32 4294901760, %v202_v50  ;;  %v6868_v3 = vpack.c.bf16 %v6776_v20, %v6773_v14 }
  0x35   :  { %v155_v34 = vand.u32 4294901760, %v6793_v29  ;;  %5945 = vmatpush3.bf16.msra.mxu0 %v6795_v30  ;;  %6017 = vmatpush3.bf16.msra.mxu1 %v6795_v30  ;;  %v6851_v57 = vpack.c.bf16 %v189_v54, %v182_v53  ;;  %v216_v60 = vsub.f32 %v6830_v47, %v215_v55  ;;  %v6875_v4 = vpack.c.bf16 %v6789_v26, %v6784_v24 }
  0x36   :  { %5946 = vmatprep.subr.bf16.mxu0 %v6707_v0  ;;  %6018 = vmatprep.subr.bf16.mxu1 %v6707_v0  ;;  %v6858_v61 = vpack.c.bf16 %v203_v59, %v196_v58  ;;  %v210_v62 = vand.u32 4294901760, %v209_v56  ;;  %v6883_v5 = vpack.c.bf16 %v6802_v33, %v6800_v32  ;;  %v6889_v6 = vpack.c.bf16 %v6830_v47, %v6816_v39 }
  0x37   :  { %v156_v40 = vsub.f32 %v6793_v29, %v155_v34  ;;  %v217_v63 = vand.u32 4294901760, %v216_v60  ;;  %v6908_v7 = vpack.c.bf16 %v173_v25, %v166_v23  ;;  %v6918_v8 = vpack.c.bf16 %v187_v37, %v180_v36 }
  0x38   :  { %v6928_v9 = vpack.c.bf16 %v201_v43, %v194_v42  ;;  %v6932_v10 = vpack.c.bf16 %v215_v55, %v208_v51  ;;  %v639_v43 = vld [vmem:[#allocation3 + $0x2] sm:$0x3] }
  0x39   :  { %v157_v48 = vand.u32 4294901760, %v156_v40  ;;  %5948 = vmatpush3.bf16.msra.mxu0 %v6814_v38  ;;  %6020 = vmatpush3.bf16.msra.mxu1 %v6814_v38  ;;  %v6862_v2 = vpack.c.bf16 %v217_v63, %v210_v62 }
  0x3a   :  { %5949 = vmatprep.subr.bf16.mxu0 %v6707_v0  ;;  %6021 = vmatprep.subr.bf16.mxu1 %v6707_v0 }
  0x3c   :  { %5042 = vmatmul.mubr.f32.vlgmr.msra.gmra.mrb[0].mxu0 %v157_v48 }
  0x3d   :  { %5951 = vmatpush3.bf16.msra.mxu0 %v6843_v52  ;;  %5060 = vmatprep.mubr.msk.f32.mxu0 %vm6708_vm1, %v6709_v1 }
  0x3e   :  { %5952 = vmatprep.subr.bf16.mxu0 %v6707_v0 }
  0x41   :  { %5954 = vmatpush3.bf16.msra.mxu0 %v6851_v57 }
  0x42   :  { %5955 = vmatprep.subr.bf16.mxu0 %v6707_v0 }
  0x45   :  { %5957 = vmatpush3.bf16.msra.mxu0 %v6858_v61 }
  0x46   :  { %5958 = vmatprep.subr.bf16.mxu0 %v6707_v0 }
  0x49   :  { %5960 = vmatpush3.bf16.msra.mxu0 %v6862_v2 }
  0x4a   :  { %5961 = vmatprep.subr.bf16.mxu0 %v6707_v0 }
  0x4c   :  { %5061 = vmatmul.mubr.f32.vlgmr.msra.gmra.mrb[0].mxu0 %v6781_v22 }
  0x4d   :  { %5963 = vmatpush3.bf16.msra.mxu0 %v6868_v3  ;;  %5079 = vmatprep.mubr.msk.f32.mxu0 %vm6708_vm1, %v6709_v1 }
  0x4e   :  { %5964 = vmatprep.subr.bf16.mxu0 %v6707_v0 }
  0x51   :  { %5966 = vmatpush3.bf16.msra.mxu0 %v6875_v4 }
  0x52   :  { %5967 = vmatprep.subr.bf16.mxu0 %v6707_v0 }
  0x55   :  { %5969 = vmatpush3.bf16.msra.mxu0 %v6883_v5 }
  0x56   :  { %5970 = vmatprep.subr.bf16.mxu0 %v6707_v0 }
  0x59   :  { %5972 = vmatpush3.bf16.msra.mxu0 %v6889_v6 }
  0x5a   :  { %5973 = vmatprep.subr.bf16.mxu0 %v6707_v0 }
  0x5c   :  { %5080 = vmatmul.mubr.f32.vlgmr.msra.gmra.mrb[0].mxu0 %v6793_v29 }
  0x5d   :  { %5975 = vmatpush3.bf16.msra.mxu0 %v6771_v12  ;;  %5098 = vmatprep.mubr.msk.f32.mxu0 %vm6708_vm1, %v6709_v1 }
  0x5e   :  { %5976 = vmatprep.subr.bf16.mxu0 %v6707_v0 }
  0x61   :  { %5978 = vmatpush3.bf16.msra.mxu0 %v6779_v21 }
  0x62   :  { %5979 = vmatprep.subr.bf16.mxu0 %v6707_v0 }
  0x65   :  { %5981 = vmatpush3.bf16.msra.mxu0 %v6795_v30 }
  0x66   :  { %5982 = vmatprep.subr.bf16.mxu0 %v6707_v0 }
  0x69   :  { %5984 = vmatpush3.bf16.msra.mxu0 %v6814_v38 }
  0x6a   :  { %5985 = vmatprep.subr.bf16.mxu0 %v6707_v0 }
  0x6c   :  { %5099 = vmatmul.mubr.f32.vlgmr.msra.gmra.mrb[0].mxu0 %v155_v34 }
  0x6d   :  { %5987 = vmatpush3.bf16.msra.mxu0 %v6908_v7  ;;  %5117 = vmatprep.mubr.msk.f32.mxu0 %vm6708_vm1, %v6709_v1 }
  0x6e   :  { %5988 = vmatprep.subr.bf16.mxu0 %v6707_v0 }
  0x71   :  { %5990 = vmatpush3.bf16.msra.mxu0 %v6918_v8 }
  0x72   :  { %5991 = vmatprep.subr.bf16.mxu0 %v6707_v0 }
  0x75   :  { %5993 = vmatpush3.bf16.msra.mxu0 %v6928_v9 }
  0x76   :  { %5994 = vmatprep.subr.bf16.mxu0 %v6707_v0 }
  0x79   :  { %5996 = vmatpush3.bf16.msra.mxu0 %v6932_v10 }
  0x7a   :  { %5997 = vmatprep.subr.bf16.mxu0 %v6707_v0 }
  0x7c   :  { %5118 = vmatmul.mubr.f32.vlgmr.msra.gmra.mrb[0].mxu0 %v6781_v22 }
  0x7d   :  { %5999 = vmatpush3.bf16.msra.mxu0 %v6771_v12  ;;  %5136 = vmatprep.mubr.msk.f32.mxu0 %vm6708_vm1, %v6709_v1 }
  0x7e   :  { %6000 = vmatprep.subr.bf16.mxu0 %v6707_v0 }
  0x81   :  { %6002 = vmatpush3.bf16.msra.mxu0 %v6779_v21 }
  0x82   :  { %6003 = vmatprep.subr.bf16.mxu0 %v6707_v0 }
  0x85   :  { %6005 = vmatpush3.bf16.msra.mxu0 %v6795_v30 }
  0x86   :  { %6006 = vmatprep.subr.bf16.mxu0 %v6707_v0 }
  0x89   :  { %6008 = vmatpush3.bf16.msra.mxu0 %v6814_v38 }
  0x8a   :  { %6081 = vmatprep.subr.bf16.mxu0 %v6707_v0 }
  0x8c   :  { %5137 = vmatmul.mubr.f32.vlgmr.msra.gmra.mrb[0].mxu0 %v6781_v22 }
  0x8d   :  { %6083 = vmatpush3.bf16.msra.mxu0 %v6771_v12  ;;  %5269 = vmatprep.mubr.msk.f32.mxu0 %vm6708_vm1, %v6709_v1 }
  0x8e   :  { %6084 = vmatprep.subr.bf16.mxu0 %v6707_v0 }
  0x91   :  { %6086 = vmatpush3.bf16.msra.mxu0 %v6779_v21 }
  0x92   :  { %6087 = vmatprep.subr.bf16.mxu0 %v6707_v0 }
  0x95   :  { %6089 = vmatpush3.bf16.msra.mxu0 %v6795_v30 }
  0x96   :  { %6090 = vmatprep.subr.bf16.mxu0 %v6707_v0 }
  0x99   :  { %6092 = vmatpush3.bf16.msra.mxu0 %v6814_v38 }
  0x9a   :  { %6093 = vmatprep.subr.bf16.mxu0 %v6707_v0 }
 0x15f   :  { %v613_v13 = vpop.f32.mrb[0].mxu0 }
 0x160   :  { %v6513_v14 = vadd.f32 %v613_v13, %v75_v11  ;;  %v5138_v15 = vpop.f32.mrb[1].mxu0 }
 0x162   :  { %v618_v16 = vsel %vm50_vm0, %v6513_v14, 0.0  ;;  %v623_v17 = vmul.f32 %v6513_v14, %v6513_v14 }
 0x163   :  { %619 = vadd.xlane.f32.xlu0 %v618_v16 }
 0x164   :  { %v624_v18 = vsel %vm50_vm0, %v623_v17, 0.0 }
 0x167   :  { %625 = vadd.xlane.f32.xlu0 %v624_v18 }
 0x1f0   :  { %v620_v19 = vpop.xlane.xlu0 %619 }
 0x1f1   :  { %v622_v20 = vmul.f32 0.015625, %v620_v19 }
 0x1f3   :  { %v628_v23 = vmul.f32 %v622_v20, %v622_v20 }
 0x1f4   :  { %v626_v22 = vpop.xlane.xlu0 %625 }
 0x1f5   :  { %v627_v24 = vmul.f32 0.015625, %v626_v22 }
 0x1f7   :  { %v629_v25 = vsub.f32 %v627_v24, %v628_v23 }
 0x1f9   :  { %v630_v26 = vadd.f32 1e-05, %v629_v25 }
 0x1fb   :  { %6611 = vrsqrt.f32 %v630_v26 }
 0x205   :  { %v6612_v28 = vpop.eup %6611 }
 0x206   :  { %v632_v29 = vmul.f32 %v6612_v28, %v6964_v27 }
 0x208   :  { %v633_v32 = vmul.f32 %v632_v29, %v622_v20  ;;  %v635_v34 = vmul.f32 %v6513_v14, %v632_v29  ;;  %v1201_v20 = vld [vmem:[#allocation3 + $0x4] sm:$0x3] }
 0x20a   :  { %v634_v33 = vsub.f32 %v6970_v31, %v633_v32 }
 0x20c   :  { %v636_v35 = vadd.f32 %v635_v34, %v634_v33 }
 0x20e   :  { %637 = vst.msk [vmem:[#allocation8] sm:$0x3] %vm50_vm0, %v636_v35  ;;  %v641_v36 = vsel %vm76_vm2, %v636_v35, 0 }
 0x20f   :  { %v716_v37 = vand.u32 4294901760, %v641_v36 }
 0x211   :  { %v717_v39 = vsub.f32 %v641_v36, %v716_v37 }
 0x213   :  { %v718_v40 = vand.u32 4294901760, %v717_v39 }
 0x215   :  { %v719_v41 = vsub.f32 %v717_v39, %v718_v40 }
 0x217   :  { %v720_v42 = vand.u32 4294901760, %v719_v41 }
 0x219   :  { %5156 = vmatmul.mubr.f32.vlgmr.msra.gmra.mrb[0].mxu1 %v720_v42 }
 0x21a   :  { %6023 = vmatpush3.bf16.msra.mxu1 %v6843_v52  ;;  %5174 = vmatprep.mubr.msk.f32.mxu1 %vm6708_vm1, %v6709_v1 }
 0x21b   :  { %6024 = vmatprep.subr.bf16.mxu1 %v6707_v0 }
 0x21e   :  { %6026 = vmatpush3.bf16.msra.mxu1 %v6851_v57 }
 0x21f   :  { %6027 = vmatprep.subr.bf16.mxu1 %v6707_v0 }
 0x222   :  { %6029 = vmatpush3.bf16.msra.mxu1 %v6858_v61 }
 0x223   :  { %6030 = vmatprep.subr.bf16.mxu1 %v6707_v0 }
 0x226   :  { %6032 = vmatpush3.bf16.msra.mxu1 %v6862_v2 }
 0x227   :  { %6033 = vmatprep.subr.bf16.mxu1 %v6707_v0 }
 0x229   :  { %5175 = vmatmul.mubr.f32.vlgmr.msra.gmra.mrb[0].mxu1 %v716_v37 }
 0x22a   :  { %6035 = vmatpush3.bf16.msra.mxu1 %v6868_v3  ;;  %5193 = vmatprep.mubr.msk.f32.mxu1 %vm6708_vm1, %v6709_v1 }
 0x22b   :  { %6036 = vmatprep.subr.bf16.mxu1 %v6707_v0 }
 0x22e   :  { %6038 = vmatpush3.bf16.msra.mxu1 %v6875_v4 }
 0x22f   :  { %6039 = vmatprep.subr.bf16.mxu1 %v6707_v0 }
 0x232   :  { %6041 = vmatpush3.bf16.msra.mxu1 %v6883_v5 }
 0x233   :  { %6042 = vmatprep.subr.bf16.mxu1 %v6707_v0 }
 0x236   :  { %6044 = vmatpush3.bf16.msra.mxu1 %v6889_v6 }
 0x237   :  { %6045 = vmatprep.subr.bf16.mxu1 %v6707_v0 }
 0x239   :  { %5194 = vmatmul.mubr.f32.vlgmr.msra.gmra.mrb[0].mxu1 %v717_v39 }
 0x23a   :  { %6047 = vmatpush3.bf16.msra.mxu1 %v6771_v12  ;;  %5212 = vmatprep.mubr.msk.f32.mxu1 %vm6708_vm1, %v6709_v1 }
 0x23b   :  { %6048 = vmatprep.subr.bf16.mxu1 %v6707_v0 }
 0x23e   :  { %6050 = vmatpush3.bf16.msra.mxu1 %v6779_v21 }
 0x23f   :  { %6051 = vmatprep.subr.bf16.mxu1 %v6707_v0 }
 0x242   :  { %6053 = vmatpush3.bf16.msra.mxu1 %v6795_v30 }
 0x243   :  { %6054 = vmatprep.subr.bf16.mxu1 %v6707_v0 }
 0x246   :  { %6056 = vmatpush3.bf16.msra.mxu1 %v6814_v38 }
 0x247   :  { %6057 = vmatprep.subr.bf16.mxu1 %v6707_v0 }
 0x249   :  { %5213 = vmatmul.mubr.f32.vlgmr.msra.gmra.mrb[0].mxu1 %v718_v40 }
 0x24a   :  { %6059 = vmatpush3.bf16.msra.mxu1 %v6908_v7  ;;  %5231 = vmatprep.mubr.msk.f32.mxu1 %vm6708_vm1, %v6709_v1 }
 0x24b   :  { %6060 = vmatprep.subr.bf16.mxu1 %v6707_v0 }
 0x24e   :  { %6062 = vmatpush3.bf16.msra.mxu1 %v6918_v8 }
 0x24f   :  { %6063 = vmatprep.subr.bf16.mxu1 %v6707_v0 }
 0x252   :  { %6065 = vmatpush3.bf16.msra.mxu1 %v6928_v9 }
 0x253   :  { %6066 = vmatprep.subr.bf16.mxu1 %v6707_v0 }
 0x256   :  { %6068 = vmatpush3.bf16.msra.mxu1 %v6932_v10 }
 0x257   :  { %6069 = vmatprep.subr.bf16.mxu1 %v6707_v0 }
 0x259   :  { %5232 = vmatmul.mubr.f32.vlgmr.msra.gmra.mrb[0].mxu1 %v716_v37 }
 0x25a   :  { %6071 = vmatpush3.bf16.msra.mxu1 %v6771_v12  ;;  %5250 = vmatprep.mubr.msk.f32.mxu1 %vm6708_vm1, %v6709_v1 }
 0x25b   :  { %6072 = vmatprep.subr.bf16.mxu1 %v6707_v0 }
 0x25e   :  { %6074 = vmatpush3.bf16.msra.mxu1 %v6779_v21 }
 0x25f   :  { %6075 = vmatprep.subr.bf16.mxu1 %v6707_v0 }
 0x262   :  { %6077 = vmatpush3.bf16.msra.mxu1 %v6795_v30 }
 0x263   :  { %6078 = vmatprep.subr.bf16.mxu1 %v6707_v0 }
 0x266   :  { %6080 = vmatpush3.bf16.msra.mxu1 %v6814_v38 }
 0x267   :  { %6153 = vmatprep.subr.bf16.mxu1 %v6707_v0 }
 0x269   :  { %5251 = vmatmul.mubr.f32.vlgmr.msra.gmra.mrb[0].mxu1 %v716_v37 }
 0x26a   :  { %6155 = vmatpush3.bf16.msra.mxu1 %v6771_v12  ;;  %5383 = vmatprep.mubr.msk.f32.mxu1 %vm6708_vm1, %v6709_v1 }
 0x26b   :  { %6156 = vmatprep.subr.bf16.mxu1 %v6707_v0 }
 0x26e   :  { %6158 = vmatpush3.bf16.msra.mxu1 %v6779_v21 }
 0x26f   :  { %6159 = vmatprep.subr.bf16.mxu1 %v6707_v0 }
 0x272   :  { %6161 = vmatpush3.bf16.msra.mxu1 %v6795_v30 }
 0x273   :  { %6162 = vmatprep.subr.bf16.mxu1 %v6707_v0 }
 0x276   :  { %6164 = vmatpush3.bf16.msra.mxu1 %v6814_v38 }
 0x277   :  { %6165 = vmatprep.subr.bf16.mxu1 %v6707_v0 }
 0x33c   :  { %v1176_v44 = vpop.f32.mrb[0].mxu1 }
 0x33d   :  { %v6514_v45 = vadd.f32 %v1176_v44, %v639_v43  ;;  %v5252_v46 = vpop.f32.mrb[1].mxu1 }
 0x33f   :  { %v1180_v47 = vsel %vm50_vm0, %v6514_v45, 0.0  ;;  %v1184_v48 = vmul.f32 %v6514_v45, %v6514_v45 }
 0x340   :  { %1181 = vadd.xlane.f32.xlu1 %v1180_v47 }
 0x341   :  { %v1185_v49 = vsel %vm50_vm0, %v1184_v48, 0.0 }
 0x344   :  { %1186 = vadd.xlane.f32.xlu1 %v1185_v49 }
 0x3cd   :  { %v1182_v50 = vpop.xlane.xlu1 %1181 }
 0x3ce   :  { %v1183_v51 = vmul.f32 0.015625, %v1182_v50 }
 0x3d0   :  { %v1189_v54 = vmul.f32 %v1183_v51, %v1183_v51 }
 0x3d1   :  { %v1187_v53 = vpop.xlane.xlu1 %1186 }
 0x3d2   :  { %v1188_v55 = vmul.f32 0.015625, %v1187_v53 }
 0x3d4   :  { %v1190_v56 = vsub.f32 %v1188_v55, %v1189_v54 }
 0x3d6   :  { %v1191_v58 = vadd.f32 1e-05, %v1190_v56 }
 0x3d8   :  { %6613 = vrsqrt.f32 %v1191_v58 }
 0x3e2   :  { %v6614_v59 = vpop.eup %6613 }
 0x3e3   :  { %v1193_v60 = vmul.f32 %v6614_v59, %v6964_v27 }
 0x3e5   :  { %v1194_v62 = vmul.f32 %v1193_v60, %v1183_v51  ;;  %v1196_v63 = vmul.f32 %v6514_v45, %v1193_v60  ;;  %v1763_v51 = vld [vmem:[#allocation3 + $0x6] sm:$0x3] }
 0x3e7   :  { %v1195_v11 = vsub.f32 %v6970_v31, %v1194_v62 }
 0x3e9   :  { %v1197_v13 = vadd.f32 %v1196_v63, %v1195_v11 }
 0x3eb   :  { %1199 = vst.msk [vmem:[#allocation8 + $0x2] sm:$0x3] %vm50_vm0, %v1197_v13  ;;  %v1203_v14 = vsel %vm76_vm2, %v1197_v13, 0 }
 0x3ec   :  { %v1278_v15 = vand.u32 4294901760, %v1203_v14 }
 0x3ee   :  { %v1279_v16 = vsub.f32 %v1203_v14, %v1278_v15 }
 0x3f0   :  { %v1280_v17 = vand.u32 4294901760, %v1279_v16 }
 0x3f2   :  { %v1281_v18 = vsub.f32 %v1279_v16, %v1280_v17 }
 0x3f4   :  { %v1282_v19 = vand.u32 4294901760, %v1281_v18 }
 0x3f6   :  { %5270 = vmatmul.mubr.f32.vlgmr.msra.gmra.mrb[2].mxu0 %v1282_v19 }
 0x3f7   :  { %6095 = vmatpush3.bf16.msra.mxu0 %v6843_v52  ;;  %5288 = vmatprep.mubr.msk.f32.mxu0 %vm6708_vm1, %v6709_v1 }
 0x3f8   :  { %6096 = vmatprep.subr.bf16.mxu0 %v6707_v0 }
 0x3fb   :  { %6098 = vmatpush3.bf16.msra.mxu0 %v6851_v57 }
 0x3fc   :  { %6099 = vmatprep.subr.bf16.mxu0 %v6707_v0 }
 0x3ff   :  { %6101 = vmatpush3.bf16.msra.mxu0 %v6858_v61 }
 0x400   :  { %6102 = vmatprep.subr.bf16.mxu0 %v6707_v0 }
 0x403   :  { %6104 = vmatpush3.bf16.msra.mxu0 %v6862_v2 }
 0x404   :  { %6105 = vmatprep.subr.bf16.mxu0 %v6707_v0 }
 0x406   :  { %5289 = vmatmul.mubr.f32.vlgmr.msra.gmra.mrb[2].mxu0 %v1278_v15 }
 0x407   :  { %6107 = vmatpush3.bf16.msra.mxu0 %v6868_v3  ;;  %5307 = vmatprep.mubr.msk.f32.mxu0 %vm6708_vm1, %v6709_v1 }
 0x408   :  { %6108 = vmatprep.subr.bf16.mxu0 %v6707_v0 }
 0x40b   :  { %6110 = vmatpush3.bf16.msra.mxu0 %v6875_v4 }
 0x40c   :  { %6111 = vmatprep.subr.bf16.mxu0 %v6707_v0 }
 0x40f   :  { %6113 = vmatpush3.bf16.msra.mxu0 %v6883_v5 }
 0x410   :  { %6114 = vmatprep.subr.bf16.mxu0 %v6707_v0 }
 0x413   :  { %6116 = vmatpush3.bf16.msra.mxu0 %v6889_v6 }
 0x414   :  { %6117 = vmatprep.subr.bf16.mxu0 %v6707_v0 }
 0x416   :  { %5308 = vmatmul.mubr.f32.vlgmr.msra.gmra.mrb[2].mxu0 %v1279_v16 }
 0x417   :  { %6119 = vmatpush3.bf16.msra.mxu0 %v6771_v12  ;;  %5326 = vmatprep.mubr.msk.f32.mxu0 %vm6708_vm1, %v6709_v1 }
 0x418   :  { %6120 = vmatprep.subr.bf16.mxu0 %v6707_v0 }
 0x41b   :  { %6122 = vmatpush3.bf16.msra.mxu0 %v6779_v21 }
 0x41c   :  { %6123 = vmatprep.subr.bf16.mxu0 %v6707_v0 }
 0x41f   :  { %6125 = vmatpush3.bf16.msra.mxu0 %v6795_v30 }
 0x420   :  { %6126 = vmatprep.subr.bf16.mxu0 %v6707_v0 }
 0x423   :  { %6128 = vmatpush3.bf16.msra.mxu0 %v6814_v38 }
 0x424   :  { %6129 = vmatprep.subr.bf16.mxu0 %v6707_v0 }
 0x426   :  { %5327 = vmatmul.mubr.f32.vlgmr.msra.gmra.mrb[2].mxu0 %v1280_v17 }
 0x427   :  { %6131 = vmatpush3.bf16.msra.mxu0 %v6908_v7  ;;  %5345 = vmatprep.mubr.msk.f32.mxu0 %vm6708_vm1, %v6709_v1 }
 0x428   :  { %6132 = vmatprep.subr.bf16.mxu0 %v6707_v0 }
 0x42b   :  { %6134 = vmatpush3.bf16.msra.mxu0 %v6918_v8 }
 0x42c   :  { %6135 = vmatprep.subr.bf16.mxu0 %v6707_v0 }
 0x42f   :  { %6137 = vmatpush3.bf16.msra.mxu0 %v6928_v9 }
 0x430   :  { %6138 = vmatprep.subr.bf16.mxu0 %v6707_v0 }
 0x433   :  { %6140 = vmatpush3.bf16.msra.mxu0 %v6932_v10 }
 0x434   :  { %6141 = vmatprep.subr.bf16.mxu0 %v6707_v0 }
 0x436   :  { %5346 = vmatmul.mubr.f32.vlgmr.msra.gmra.mrb[2].mxu0 %v1278_v15 }
 0x437   :  { %6143 = vmatpush3.bf16.msra.mxu0 %v6771_v12  ;;  %5364 = vmatprep.mubr.msk.f32.mxu0 %vm6708_vm1, %v6709_v1 }
 0x438   :  { %6144 = vmatprep.subr.bf16.mxu0 %v6707_v0 }
 0x43b   :  { %6146 = vmatpush3.bf16.msra.mxu0 %v6779_v21 }
 0x43c   :  { %6147 = vmatprep.subr.bf16.mxu0 %v6707_v0 }
 0x43f   :  { %6149 = vmatpush3.bf16.msra.mxu0 %v6795_v30 }
 0x440   :  { %6150 = vmatprep.subr.bf16.mxu0 %v6707_v0 }
 0x443   :  { %6152 = vmatpush3.bf16.msra.mxu0 %v6814_v38 }
 0x444   :  { %6225 = vmatprep.subr.bf16.mxu0 %v6707_v0 }
 0x446   :  { %5365 = vmatmul.mubr.f32.vlgmr.msra.gmra.mrb[2].mxu0 %v1278_v15 }
 0x447   :  { %6227 = vmatpush3.bf16.msra.mxu0 %v6771_v12  ;;  %5497 = vmatprep.mubr.msk.f32.mxu0 %vm6708_vm1, %v6709_v1 }
 0x448   :  { %6228 = vmatprep.subr.bf16.mxu0 %v6707_v0 }
 0x44b   :  { %6230 = vmatpush3.bf16.msra.mxu0 %v6779_v21 }
 0x44c   :  { %6231 = vmatprep.subr.bf16.mxu0 %v6707_v0 }
 0x44f   :  { %6233 = vmatpush3.bf16.msra.mxu0 %v6795_v30 }
 0x450   :  { %6234 = vmatprep.subr.bf16.mxu0 %v6707_v0 }
 0x453   :  { %6236 = vmatpush3.bf16.msra.mxu0 %v6814_v38 }
 0x454   :  { %6237 = vmatprep.subr.bf16.mxu0 %v6707_v0 }
 0x519   :  { %v1738_v22 = vpop.f32.mrb[2].mxu0 }
 0x51a   :  { %v6515_v23 = vadd.f32 %v1738_v22, %v1201_v20  ;;  %v5366_v24 = vpop.f32.mrb[3].mxu0 }
 0x51c   :  { %v1742_v25 = vsel %vm50_vm0, %v6515_v23, 0.0  ;;  %v1746_v26 = vmul.f32 %v6515_v23, %v6515_v23 }
 0x51d   :  { %1743 = vadd.xlane.f32.xlu0 %v1742_v25 }
 0x51e   :  { %v1747_v28 = vsel %vm50_vm0, %v1746_v26, 0.0 }
 0x51f   :  { %1748 = vadd.xlane.f32.xlu1 %v1747_v28 }
 0x5aa   :  { %v1744_v29 = vpop.xlane.xlu0 %1743 }
 0x5ab   :  { %v1745_v32 = vmul.f32 0.015625, %v1744_v29 }
 0x5ac   :  { %v1749_v33 = vpop.xlane.xlu1 %1748 }
 0x5ad   :  { %v1751_v34 = vmul.f32 %v1745_v32, %v1745_v32  ;;  %v1750_v35 = vmul.f32 0.015625, %v1749_v33 }
 0x5af   :  { %v1752_v36 = vsub.f32 %v1750_v35, %v1751_v34 }
 0x5b1   :  { %v1753_v37 = vadd.f32 1e-05, %v1752_v36 }
 0x5b3   :  { %6615 = vrsqrt.f32 %v1753_v37 }
 0x5bd   :  { %v6616_v39 = vpop.eup %6615 }
 0x5be   :  { %v1755_v40 = vmul.f32 %v6616_v39, %v6964_v27 }
 0x5c0   :  { %v1756_v41 = vmul.f32 %v1755_v40, %v1745_v32  ;;  %v1758_v42 = vmul.f32 %v6515_v23, %v1755_v40  ;;  %v2325_v32 = vld [vmem:[#allocation3 + $0x8] sm:$0x3] }
 0x5c2   :  { %v1757_v43 = vsub.f32 %v6970_v31, %v1756_v41 }
 0x5c4   :  { %v1759_v44 = vadd.f32 %v1758_v42, %v1757_v43 }
 0x5c6   :  { %1761 = vst.msk [vmem:[#allocation8 + $0x4] sm:$0x3] %vm50_vm0, %v1759_v44  ;;  %v1765_v45 = vsel %vm76_vm2, %v1759_v44, 0 }
 0x5c7   :  { %v1840_v46 = vand.u32 4294901760, %v1765_v45 }
 0x5c9   :  { %v1841_v47 = vsub.f32 %v1765_v45, %v1840_v46 }
 0x5cb   :  { %v1842_v48 = vand.u32 4294901760, %v1841_v47 }
 0x5cd   :  { %v1843_v49 = vsub.f32 %v1841_v47, %v1842_v48 }
 0x5cf   :  { %v1844_v50 = vand.u32 4294901760, %v1843_v49 }
 0x5d1   :  { %5384 = vmatmul.mubr.f32.vlgmr.msra.gmra.mrb[2].mxu1 %v1844_v50 }
 0x5d2   :  { %6167 = vmatpush3.bf16.msra.mxu1 %v6843_v52  ;;  %5402 = vmatprep.mubr.msk.f32.mxu1 %vm6708_vm1, %v6709_v1 }
 0x5d3   :  { %6168 = vmatprep.subr.bf16.mxu1 %v6707_v0 }
 0x5d6   :  { %6170 = vmatpush3.bf16.msra.mxu1 %v6851_v57 }
 0x5d7   :  { %6171 = vmatprep.subr.bf16.mxu1 %v6707_v0 }
 0x5da   :  { %6173 = vmatpush3.bf16.msra.mxu1 %v6858_v61 }
 0x5db   :  { %6174 = vmatprep.subr.bf16.mxu1 %v6707_v0 }
 0x5de   :  { %6176 = vmatpush3.bf16.msra.mxu1 %v6862_v2 }
 0x5df   :  { %6177 = vmatprep.subr.bf16.mxu1 %v6707_v0 }
 0x5e1   :  { %5403 = vmatmul.mubr.f32.vlgmr.msra.gmra.mrb[2].mxu1 %v1840_v46 }
 0x5e2   :  { %6179 = vmatpush3.bf16.msra.mxu1 %v6868_v3  ;;  %5421 = vmatprep.mubr.msk.f32.mxu1 %vm6708_vm1, %v6709_v1 }
 0x5e3   :  { %6180 = vmatprep.subr.bf16.mxu1 %v6707_v0 }
 0x5e6   :  { %6182 = vmatpush3.bf16.msra.mxu1 %v6875_v4 }
 0x5e7   :  { %6183 = vmatprep.subr.bf16.mxu1 %v6707_v0 }
 0x5ea   :  { %6185 = vmatpush3.bf16.msra.mxu1 %v6883_v5 }
 0x5eb   :  { %6186 = vmatprep.subr.bf16.mxu1 %v6707_v0 }
 0x5ee   :  { %6188 = vmatpush3.bf16.msra.mxu1 %v6889_v6 }
 0x5ef   :  { %6189 = vmatprep.subr.bf16.mxu1 %v6707_v0 }
 0x5f1   :  { %5422 = vmatmul.mubr.f32.vlgmr.msra.gmra.mrb[2].mxu1 %v1841_v47 }
 0x5f2   :  { %6191 = vmatpush3.bf16.msra.mxu1 %v6771_v12  ;;  %5440 = vmatprep.mubr.msk.f32.mxu1 %vm6708_vm1, %v6709_v1 }
 0x5f3   :  { %6192 = vmatprep.subr.bf16.mxu1 %v6707_v0 }
 0x5f6   :  { %6194 = vmatpush3.bf16.msra.mxu1 %v6779_v21 }
 0x5f7   :  { %6195 = vmatprep.subr.bf16.mxu1 %v6707_v0 }
 0x5fa   :  { %6197 = vmatpush3.bf16.msra.mxu1 %v6795_v30 }
 0x5fb   :  { %6198 = vmatprep.subr.bf16.mxu1 %v6707_v0 }
 0x5fe   :  { %6200 = vmatpush3.bf16.msra.mxu1 %v6814_v38 }
 0x5ff   :  { %6201 = vmatprep.subr.bf16.mxu1 %v6707_v0 }
 0x601   :  { %5441 = vmatmul.mubr.f32.vlgmr.msra.gmra.mrb[2].mxu1 %v1842_v48 }
 0x602   :  { %6203 = vmatpush3.bf16.msra.mxu1 %v6908_v7  ;;  %5459 = vmatprep.mubr.msk.f32.mxu1 %vm6708_vm1, %v6709_v1 }
 0x603   :  { %6204 = vmatprep.subr.bf16.mxu1 %v6707_v0 }
 0x606   :  { %6206 = vmatpush3.bf16.msra.mxu1 %v6918_v8 }
 0x607   :  { %6207 = vmatprep.subr.bf16.mxu1 %v6707_v0 }
 0x60a   :  { %6209 = vmatpush3.bf16.msra.mxu1 %v6928_v9 }
 0x60b   :  { %6210 = vmatprep.subr.bf16.mxu1 %v6707_v0 }
 0x60e   :  { %6212 = vmatpush3.bf16.msra.mxu1 %v6932_v10 }
 0x60f   :  { %6213 = vmatprep.subr.bf16.mxu1 %v6707_v0 }
 0x611   :  { %5460 = vmatmul.mubr.f32.vlgmr.msra.gmra.mrb[2].mxu1 %v1840_v46 }
 0x612   :  { %6215 = vmatpush3.bf16.msra.mxu1 %v6771_v12  ;;  %5478 = vmatprep.mubr.msk.f32.mxu1 %vm6708_vm1, %v6709_v1 }
 0x613   :  { %6216 = vmatprep.subr.bf16.mxu1 %v6707_v0 }
 0x616   :  { %6218 = vmatpush3.bf16.msra.mxu1 %v6779_v21 }
 0x617   :  { %6219 = vmatprep.subr.bf16.mxu1 %v6707_v0 }
 0x61a   :  { %6221 = vmatpush3.bf16.msra.mxu1 %v6795_v30 }
 0x61b   :  { %6222 = vmatprep.subr.bf16.mxu1 %v6707_v0 }
 0x61e   :  { %6224 = vmatpush3.bf16.msra.mxu1 %v6814_v38 }
 0x61f   :  { %6297 = vmatprep.subr.bf16.mxu1 %v6707_v0 }
 0x621   :  { %5479 = vmatmul.mubr.f32.vlgmr.msra.gmra.mrb[2].mxu1 %v1840_v46 }
 0x622   :  { %6299 = vmatpush3.bf16.msra.mxu1 %v6771_v12  ;;  %5611 = vmatprep.mubr.msk.f32.mxu1 %vm6708_vm1, %v6709_v1 }
 0x623   :  { %6300 = vmatprep.subr.bf16.mxu1 %v6707_v0 }
 0x626   :  { %6302 = vmatpush3.bf16.msra.mxu1 %v6779_v21 }
 0x627   :  { %6303 = vmatprep.subr.bf16.mxu1 %v6707_v0 }
 0x62a   :  { %6305 = vmatpush3.bf16.msra.mxu1 %v6795_v30 }
 0x62b   :  { %6306 = vmatprep.subr.bf16.mxu1 %v6707_v0 }
 0x62e   :  { %6308 = vmatpush3.bf16.msra.mxu1 %v6814_v38 }
 0x62f   :  { %6309 = vmatprep.subr.bf16.mxu1 %v6707_v0 }
 0x6f4   :  { %v2300_v53 = vpop.f32.mrb[2].mxu1 }
 0x6f5   :  { %v6516_v54 = vadd.f32 %v2300_v53, %v1763_v51  ;;  %v5480_v55 = vpop.f32.mrb[3].mxu1 }
 0x6f7   :  { %v2304_v56 = vsel %vm50_vm0, %v6516_v54, 0.0  ;;  %v2308_v58 = vmul.f32 %v6516_v54, %v6516_v54 }
 0x6f8   :  { %2305 = vadd.xlane.f32.xlu0 %v2304_v56 }
 0x6f9   :  { %v2309_v59 = vsel %vm50_vm0, %v2308_v58, 0.0 }
 0x6fa   :  { %2310 = vadd.xlane.f32.xlu1 %v2309_v59 }
 0x785   :  { %v2306_v60 = vpop.xlane.xlu0 %2305 }
 0x786   :  { %v2307_v62 = vmul.f32 0.015625, %v2306_v60 }
 0x787   :  { %v2311_v63 = vpop.xlane.xlu1 %2310 }
 0x788   :  { %v2313_v11 = vmul.f32 %v2307_v62, %v2307_v62  ;;  %v2312_v13 = vmul.f32 0.015625, %v2311_v63 }
 0x78a   :  { %v2314_v14 = vsub.f32 %v2312_v13, %v2313_v11 }
 0x78c   :  { %v2315_v15 = vadd.f32 1e-05, %v2314_v14 }
 0x78e   :  { %6617 = vrsqrt.f32 %v2315_v15 }
 0x798   :  { %v6618_v16 = vpop.eup %6617 }
 0x799   :  { %v2317_v17 = vmul.f32 %v6618_v16, %v6964_v27 }
 0x79b   :  { %v2318_v18 = vmul.f32 %v2317_v17, %v2307_v62  ;;  %v2320_v19 = vmul.f32 %v6516_v54, %v2317_v17  ;;  %v2887_v62 = vld [vmem:[#allocation3 + $0xa] sm:$0x3] }
 0x79d   :  { %v2319_v20 = vsub.f32 %v6970_v31, %v2318_v18 }
 0x79f   :  { %v2321_v22 = vadd.f32 %v2320_v19, %v2319_v20 }
 0x7a1   :  { %2323 = vst.msk [vmem:[#allocation8 + $0x6] sm:$0x3] %vm50_vm0, %v2321_v22  ;;  %v2327_v23 = vsel %vm76_vm2, %v2321_v22, 0 }
 0x7a2   :  { %v2402_v24 = vand.u32 4294901760, %v2327_v23 }
 0x7a4   :  { %v2403_v25 = vsub.f32 %v2327_v23, %v2402_v24 }
 0x7a6   :  { %v2404_v26 = vand.u32 4294901760, %v2403_v25 }
 0x7a8   :  { %v2405_v28 = vsub.f32 %v2403_v25, %v2404_v26 }
 0x7aa   :  { %v2406_v29 = vand.u32 4294901760, %v2405_v28 }
 0x7ac   :  { %5498 = vmatmul.mubr.f32.vlgmr.msra.gmra.mrb[4].mxu0 %v2406_v29 }
 0x7ad   :  { %6239 = vmatpush3.bf16.msra.mxu0 %v6843_v52  ;;  %5516 = vmatprep.mubr.msk.f32.mxu0 %vm6708_vm1, %v6709_v1 }
 0x7ae   :  { %6240 = vmatprep.subr.bf16.mxu0 %v6707_v0 }
 0x7b1   :  { %6242 = vmatpush3.bf16.msra.mxu0 %v6851_v57 }
 0x7b2   :  { %6243 = vmatprep.subr.bf16.mxu0 %v6707_v0 }
 0x7b5   :  { %6245 = vmatpush3.bf16.msra.mxu0 %v6858_v61 }
 0x7b6   :  { %6246 = vmatprep.subr.bf16.mxu0 %v6707_v0 }
 0x7b9   :  { %6248 = vmatpush3.bf16.msra.mxu0 %v6862_v2 }
 0x7ba   :  { %6249 = vmatprep.subr.bf16.mxu0 %v6707_v0 }
 0x7bc   :  { %5517 = vmatmul.mubr.f32.vlgmr.msra.gmra.mrb[4].mxu0 %v2402_v24 }
 0x7bd   :  { %6251 = vmatpush3.bf16.msra.mxu0 %v6868_v3  ;;  %5535 = vmatprep.mubr.msk.f32.mxu0 %vm6708_vm1, %v6709_v1 }
 0x7be   :  { %6252 = vmatprep.subr.bf16.mxu0 %v6707_v0 }
 0x7c1   :  { %6254 = vmatpush3.bf16.msra.mxu0 %v6875_v4 }
 0x7c2   :  { %6255 = vmatprep.subr.bf16.mxu0 %v6707_v0 }
 0x7c5   :  { %6257 = vmatpush3.bf16.msra.mxu0 %v6883_v5 }
 0x7c6   :  { %6258 = vmatprep.subr.bf16.mxu0 %v6707_v0 }
 0x7c9   :  { %6260 = vmatpush3.bf16.msra.mxu0 %v6889_v6 }
 0x7ca   :  { %6261 = vmatprep.subr.bf16.mxu0 %v6707_v0 }
 0x7cc   :  { %5536 = vmatmul.mubr.f32.vlgmr.msra.gmra.mrb[4].mxu0 %v2403_v25 }
 0x7cd   :  { %6263 = vmatpush3.bf16.msra.mxu0 %v6771_v12  ;;  %5554 = vmatprep.mubr.msk.f32.mxu0 %vm6708_vm1, %v6709_v1 }
 0x7ce   :  { %6264 = vmatprep.subr.bf16.mxu0 %v6707_v0 }
 0x7d1   :  { %6266 = vmatpush3.bf16.msra.mxu0 %v6779_v21 }
 0x7d2   :  { %6267 = vmatprep.subr.bf16.mxu0 %v6707_v0 }
 0x7d5   :  { %6269 = vmatpush3.bf16.msra.mxu0 %v6795_v30 }
 0x7d6   :  { %6270 = vmatprep.subr.bf16.mxu0 %v6707_v0 }
 0x7d9   :  { %6272 = vmatpush3.bf16.msra.mxu0 %v6814_v38 }
 0x7da   :  { %6273 = vmatprep.subr.bf16.mxu0 %v6707_v0 }
 0x7dc   :  { %5555 = vmatmul.mubr.f32.vlgmr.msra.gmra.mrb[4].mxu0 %v2404_v26 }
 0x7dd   :  { %6275 = vmatpush3.bf16.msra.mxu0 %v6908_v7  ;;  %5573 = vmatprep.mubr.msk.f32.mxu0 %vm6708_vm1, %v6709_v1 }
 0x7de   :  { %6276 = vmatprep.subr.bf16.mxu0 %v6707_v0 }
 0x7e1   :  { %6278 = vmatpush3.bf16.msra.mxu0 %v6918_v8 }
 0x7e2   :  { %6279 = vmatprep.subr.bf16.mxu0 %v6707_v0 }
 0x7e5   :  { %6281 = vmatpush3.bf16.msra.mxu0 %v6928_v9 }
 0x7e6   :  { %6282 = vmatprep.subr.bf16.mxu0 %v6707_v0 }
 0x7e9   :  { %6284 = vmatpush3.bf16.msra.mxu0 %v6932_v10 }
 0x7ea   :  { %6285 = vmatprep.subr.bf16.mxu0 %v6707_v0 }
 0x7ec   :  { %5574 = vmatmul.mubr.f32.vlgmr.msra.gmra.mrb[4].mxu0 %v2402_v24 }
 0x7ed   :  { %6287 = vmatpush3.bf16.msra.mxu0 %v6771_v12  ;;  %5592 = vmatprep.mubr.msk.f32.mxu0 %vm6708_vm1, %v6709_v1 }
 0x7ee   :  { %6288 = vmatprep.subr.bf16.mxu0 %v6707_v0 }
 0x7f1   :  { %6290 = vmatpush3.bf16.msra.mxu0 %v6779_v21 }
 0x7f2   :  { %6291 = vmatprep.subr.bf16.mxu0 %v6707_v0 }
 0x7f5   :  { %6293 = vmatpush3.bf16.msra.mxu0 %v6795_v30 }
 0x7f6   :  { %6294 = vmatprep.subr.bf16.mxu0 %v6707_v0 }
 0x7f9   :  { %6296 = vmatpush3.bf16.msra.mxu0 %v6814_v38 }
 0x7fa   :  { %6369 = vmatprep.subr.bf16.mxu0 %v6707_v0 }
 0x7fc   :  { %5593 = vmatmul.mubr.f32.vlgmr.msra.gmra.mrb[4].mxu0 %v2402_v24 }
 0x7fd   :  { %6371 = vmatpush3.bf16.msra.mxu0 %v6771_v12  ;;  %5725 = vmatprep.mubr.msk.f32.mxu0 %vm6708_vm1, %v6709_v1 }
 0x7fe   :  { %6372 = vmatprep.subr.bf16.mxu0 %v6707_v0 }
 0x801   :  { %6374 = vmatpush3.bf16.msra.mxu0 %v6779_v21 }
 0x802   :  { %6375 = vmatprep.subr.bf16.mxu0 %v6707_v0 }
 0x805   :  { %6377 = vmatpush3.bf16.msra.mxu0 %v6795_v30 }
 0x806   :  { %6378 = vmatprep.subr.bf16.mxu0 %v6707_v0 }
 0x809   :  { %6380 = vmatpush3.bf16.msra.mxu0 %v6814_v38 }
 0x80a   :  { %6381 = vmatprep.subr.bf16.mxu0 %v6707_v0 }
 0x8cf   :  { %v2862_v33 = vpop.f32.mrb[4].mxu0 }
 0x8d0   :  { %v6517_v34 = vadd.f32 %v2862_v33, %v2325_v32  ;;  %v5594_v35 = vpop.f32.mrb[5].mxu0 }
 0x8d2   :  { %v2866_v36 = vsel %vm50_vm0, %v6517_v34, 0.0  ;;  %v2870_v37 = vmul.f32 %v6517_v34, %v6517_v34 }
 0x8d3   :  { %2867 = vadd.xlane.f32.xlu0 %v2866_v36 }
 0x8d4   :  { %v2871_v39 = vsel %vm50_vm0, %v2870_v37, 0.0 }
 0x8d5   :  { %2872 = vadd.xlane.f32.xlu1 %v2871_v39 }
 0x960   :  { %v2868_v40 = vpop.xlane.xlu0 %2867 }
 0x961   :  { %v2869_v41 = vmul.f32 0.015625, %v2868_v40 }
 0x962   :  { %v2873_v42 = vpop.xlane.xlu1 %2872 }
 0x963   :  { %v2875_v43 = vmul.f32 %v2869_v41, %v2869_v41  ;;  %v2874_v44 = vmul.f32 0.015625, %v2873_v42 }
 0x965   :  { %v2876_v45 = vsub.f32 %v2874_v44, %v2875_v43 }
 0x967   :  { %v2877_v46 = vadd.f32 1e-05, %v2876_v45 }
 0x969   :  { %6619 = vrsqrt.f32 %v2877_v46 }
 0x973   :  { %v6620_v47 = vpop.eup %6619 }
 0x974   :  { %v2879_v48 = vmul.f32 %v6620_v47, %v6964_v27 }
 0x976   :  { %v2880_v49 = vmul.f32 %v2879_v48, %v2869_v41  ;;  %v2882_v50 = vmul.f32 %v6517_v34, %v2879_v48 }
 0x978   :  { %v2881_v51 = vsub.f32 %v6970_v31, %v2880_v49 }
 0x97a   :  { %v2883_v53 = vadd.f32 %v2882_v50, %v2881_v51 }
 0x97c   :  { %2885 = vst.msk [vmem:[#allocation8 + $0x8] sm:$0x3] %vm50_vm0, %v2883_v53  ;;  %v2889_v54 = vsel %vm76_vm2, %v2883_v53, 0 }
 0x97d   :  { %v2964_v55 = vand.u32 4294901760, %v2889_v54 }
 0x97f   :  { %v2965_v56 = vsub.f32 %v2889_v54, %v2964_v55 }
 0x981   :  { %v2966_v58 = vand.u32 4294901760, %v2965_v56 }
 0x983   :  { %v2967_v59 = vsub.f32 %v2965_v56, %v2966_v58 }
 0x985   :  { %v2968_v60 = vand.u32 4294901760, %v2967_v59 }
 0x987   :  { %5612 = vmatmul.mubr.f32.vlgmr.msra.gmra.mrb[4].mxu1 %v2968_v60  ;;  %v7365_v60 = vld [vmem:[%s7443_s3] ss:$0 sm:$0xff] }
 0x988   :  { %6311 = vmatpush3.bf16.msra.mxu1 %v6843_v52  ;;  %5630 = vmatprep.mubr.msk.f32.mxu1 %vm6708_vm1, %v6709_v1 }
 0x989   :  { %6312 = vmatprep.subr.bf16.mxu1 %v6707_v0 }
 0x98c   :  { %6314 = vmatpush3.bf16.msra.mxu1 %v6851_v57 }
 0x98d   :  { %6315 = vmatprep.subr.bf16.mxu1 %v6707_v0 }
 0x990   :  { %6317 = vmatpush3.bf16.msra.mxu1 %v6858_v61 }
 0x991   :  { %6318 = vmatprep.subr.bf16.mxu1 %v6707_v0 }
 0x994   :  { %6320 = vmatpush3.bf16.msra.mxu1 %v6862_v2 }
 0x995   :  { %6321 = vmatprep.subr.bf16.mxu1 %v6707_v0 }
 0x997   :  { %5631 = vmatmul.mubr.f32.vlgmr.msra.gmra.mrb[4].mxu1 %v2964_v55 }
 0x998   :  { %6323 = vmatpush3.bf16.msra.mxu1 %v6868_v3  ;;  %5649 = vmatprep.mubr.msk.f32.mxu1 %vm6708_vm1, %v6709_v1 }
 0x999   :  { %6324 = vmatprep.subr.bf16.mxu1 %v6707_v0 }
 0x99c   :  { %6326 = vmatpush3.bf16.msra.mxu1 %v6875_v4 }
 0x99d   :  { %6327 = vmatprep.subr.bf16.mxu1 %v6707_v0 }
 0x9a0   :  { %6329 = vmatpush3.bf16.msra.mxu1 %v6883_v5 }
 0x9a1   :  { %6330 = vmatprep.subr.bf16.mxu1 %v6707_v0 }
 0x9a4   :  { %6332 = vmatpush3.bf16.msra.mxu1 %v6889_v6 }
 0x9a5   :  { %6333 = vmatprep.subr.bf16.mxu1 %v6707_v0 }
 0x9a7   :  { %5650 = vmatmul.mubr.f32.vlgmr.msra.gmra.mrb[4].mxu1 %v2965_v56 }
 0x9a8   :  { %6335 = vmatpush3.bf16.msra.mxu1 %v6771_v12  ;;  %5668 = vmatprep.mubr.msk.f32.mxu1 %vm6708_vm1, %v6709_v1 }
 0x9a9   :  { %6336 = vmatprep.subr.bf16.mxu1 %v6707_v0 }
 0x9ac   :  { %6338 = vmatpush3.bf16.msra.mxu1 %v6779_v21 }
 0x9ad   :  { %6339 = vmatprep.subr.bf16.mxu1 %v6707_v0 }
 0x9b0   :  { %6341 = vmatpush3.bf16.msra.mxu1 %v6795_v30 }
 0x9b1   :  { %6342 = vmatprep.subr.bf16.mxu1 %v6707_v0 }
 0x9b4   :  { %6344 = vmatpush3.bf16.msra.mxu1 %v6814_v38 }
 0x9b5   :  { %6345 = vmatprep.subr.bf16.mxu1 %v6707_v0 }
 0x9b7   :  { %5669 = vmatmul.mubr.f32.vlgmr.msra.gmra.mrb[4].mxu1 %v2966_v58 }
 0x9b8   :  { %6347 = vmatpush3.bf16.msra.mxu1 %v6908_v7  ;;  %5687 = vmatprep.mubr.msk.f32.mxu1 %vm6708_vm1, %v6709_v1 }
 0x9b9   :  { %6348 = vmatprep.subr.bf16.mxu1 %v6707_v0 }
 0x9bc   :  { %6350 = vmatpush3.bf16.msra.mxu1 %v6918_v8 }
 0x9bd   :  { %6351 = vmatprep.subr.bf16.mxu1 %v6707_v0 }
 0x9c0   :  { %6353 = vmatpush3.bf16.msra.mxu1 %v6928_v9 }
 0x9c1   :  { %6354 = vmatprep.subr.bf16.mxu1 %v6707_v0 }
 0x9c4   :  { %6356 = vmatpush3.bf16.msra.mxu1 %v6932_v10 }
 0x9c5   :  { %6357 = vmatprep.subr.bf16.mxu1 %v6707_v0 }
 0x9c7   :  { %5688 = vmatmul.mubr.f32.vlgmr.msra.gmra.mrb[4].mxu1 %v2964_v55 }
 0x9c8   :  { %6359 = vmatpush3.bf16.msra.mxu1 %v6771_v12  ;;  %5706 = vmatprep.mubr.msk.f32.mxu1 %vm6708_vm1, %v6709_v1 }
 0x9c9   :  { %6360 = vmatprep.subr.bf16.mxu1 %v6707_v0 }
 0x9cc   :  { %6362 = vmatpush3.bf16.msra.mxu1 %v6779_v21 }
 0x9cd   :  { %6363 = vmatprep.subr.bf16.mxu1 %v6707_v0 }
 0x9d0   :  { %6365 = vmatpush3.bf16.msra.mxu1 %v6795_v30 }
 0x9d1   :  { %6366 = vmatprep.subr.bf16.mxu1 %v6707_v0 }
 0x9d4   :  { %6368 = vmatpush3.bf16.msra.mxu1 %v6814_v38 }
 0x9d5   :  { %6441 = vmatprep.subr.bf16.mxu1 %v6707_v0 }
 0x9d7   :  { %5707 = vmatmul.mubr.f32.vlgmr.msra.gmra.mrb[4].mxu1 %v2964_v55  ;;  %v7359_v55 = vld [vmem:[%s7442_s2] ss:$0 sm:$0xff]  ;;  %s6710_s2 = smov [#allocation8]  }
 0x9d8   :  { %6443 = vmatpush3.bf16.msra.mxu1 %v6771_v12  ;;  %5839 = vmatprep.mubr.msk.f32.mxu1 %vm6708_vm1, %v6709_v1  ;;  %s4578_s3 = sshll.u32 %s6710_s2, 4  ;;  %s4579_s3 = int_to_ptr.vmem [resolvable:$true] %s4578_s3 }
 0x9d9   :  { %6444 = vmatprep.subr.bf16.mxu1 %v6707_v0  ;;  %s6673_s23 = scalar_lea.vmem %s4579_s3, 256  ;;  %p6678_p3 = scmp.lt.s32.totalorder %s4579_s3, %s4579_s3 }
 0x9da   :  { %p6674_p2 = scmp.ne.s32.totalorder %s4579_s3, %s6673_s23  ;;  %p6679_p4 = scmp.lt.s32.totalorder %s6673_s23, %s6673_s23 }
 0x9dc   :  { %6446 = vmatpush3.bf16.msra.mxu1 %v6779_v21  ;;  %p6680_p5 = por %p6679_p4, %p6678_p3 }
 0x9dd   :  { %6447 = vmatprep.subr.bf16.mxu1 %v6707_v0 }
 0x9de   :  { %p6681_p6 = pnand %p6680_p5, %p6674_p2 }
 0x9e0   :  { %6449 = vmatpush3.bf16.msra.mxu1 %v6795_v30 }
 0x9e1   :  { %6450 = vmatprep.subr.bf16.mxu1 %v6707_v0 }
 0x9e4   :  { %6452 = vmatpush3.bf16.msra.mxu1 %v6814_v38 }
 0x9e5   :  { %6453 = vmatprep.subr.bf16.mxu1 %v6707_v0 }
 0xaaa   :  { %v3424_v63 = vpop.f32.mrb[4].mxu1 }
 0xaab   :  { %v6518_v11 = vadd.f32 %v3424_v63, %v2887_v62  ;;  %v5708_v13 = vpop.f32.mrb[5].mxu1 }
 0xaad   :  { %v3428_v14 = vsel %vm50_vm0, %v6518_v11, 0.0  ;;  %v3432_v15 = vmul.f32 %v6518_v11, %v6518_v11 }
 0xaae   :  { %3429 = vadd.xlane.f32.xlu0 %v3428_v14 }
 0xaaf   :  { %v3433_v16 = vsel %vm50_vm0, %v3432_v15, 0.0 }
 0xab0   :  { %3434 = vadd.xlane.f32.xlu1 %v3433_v16 }
 0xb3b   :  { %v3430_v17 = vpop.xlane.xlu0 %3429 }
 0xb3c   :  { %v3431_v18 = vmul.f32 0.015625, %v3430_v17 }
 0xb3d   :  { %v3435_v19 = vpop.xlane.xlu1 %3434 }
 0xb3e   :  { %v3437_v20 = vmul.f32 %v3431_v18, %v3431_v18  ;;  %v3436_v22 = vmul.f32 0.015625, %v3435_v19 }
 0xb40   :  { %v3438_v23 = vsub.f32 %v3436_v22, %v3437_v20 }
 0xb42   :  { %v3439_v24 = vadd.f32 1e-05, %v3438_v23 }
 0xb44   :  { %6621 = vrsqrt.f32 %v3439_v24 }
 0xb4e   :  { %v6622_v25 = vpop.eup %6621 }
 0xb4f   :  { %v3441_v26 = vmul.f32 %v6622_v25, %v6964_v27  ;;  %v3449_v27 = vld [vmem:[#allocation3 + $0xc] sm:$0x3] }
 0xb51   :  { %v3442_v28 = vmul.f32 %v3441_v26, %v3431_v18  ;;  %v3444_v29 = vmul.f32 %v6518_v11, %v3441_v26 }
 0xb53   :  { %v3443_v32 = vsub.f32 %v6970_v31, %v3442_v28 }
 0xb55   :  { %v3445_v33 = vadd.f32 %v3444_v29, %v3443_v32 }
 0xb57   :  { %3447 = vst.msk [vmem:[#allocation8 + $0xa] sm:$0x3] %vm50_vm0, %v3445_v33  ;;  %v3451_v34 = vsel %vm76_vm2, %v3445_v33, 0 }
 0xb58   :  { %v3526_v35 = vand.u32 4294901760, %v3451_v34 }
 0xb5a   :  { %v3527_v36 = vsub.f32 %v3451_v34, %v3526_v35 }
 0xb5c   :  { %v3528_v37 = vand.u32 4294901760, %v3527_v36 }
 0xb5e   :  { %v3529_v39 = vsub.f32 %v3527_v36, %v3528_v37 }
 0xb60   :  { %v3530_v40 = vand.u32 4294901760, %v3529_v39 }
 0xb62   :  { %5726 = vmatmul.mubr.f32.vlgmr.msra.gmra.mrb[6].mxu0 %v3530_v40 }
 0xb63   :  { %6383 = vmatpush3.bf16.msra.mxu0 %v6843_v52  ;;  %5744 = vmatprep.mubr.msk.f32.mxu0 %vm6708_vm1, %v6709_v1 }
 0xb64   :  { %6384 = vmatprep.subr.bf16.mxu0 %v6707_v0 }
 0xb67   :  { %6386 = vmatpush3.bf16.msra.mxu0 %v6851_v57 }
 0xb68   :  { %6387 = vmatprep.subr.bf16.mxu0 %v6707_v0 }
 0xb6b   :  { %6389 = vmatpush3.bf16.msra.mxu0 %v6858_v61 }
 0xb6c   :  { %6390 = vmatprep.subr.bf16.mxu0 %v6707_v0 }
 0xb6f   :  { %6392 = vmatpush3.bf16.msra.mxu0 %v6862_v2 }
 0xb70   :  { %6393 = vmatprep.subr.bf16.mxu0 %v6707_v0 }
 0xb72   :  { %5745 = vmatmul.mubr.f32.vlgmr.msra.gmra.mrb[6].mxu0 %v3526_v35 }
 0xb73   :  { %6395 = vmatpush3.bf16.msra.mxu0 %v6868_v3  ;;  %5763 = vmatprep.mubr.msk.f32.mxu0 %vm6708_vm1, %v6709_v1 }
 0xb74   :  { %6396 = vmatprep.subr.bf16.mxu0 %v6707_v0 }
 0xb77   :  { %6398 = vmatpush3.bf16.msra.mxu0 %v6875_v4 }
 0xb78   :  { %6399 = vmatprep.subr.bf16.mxu0 %v6707_v0 }
 0xb7b   :  { %6401 = vmatpush3.bf16.msra.mxu0 %v6883_v5 }
 0xb7c   :  { %6402 = vmatprep.subr.bf16.mxu0 %v6707_v0 }
 0xb7f   :  { %6404 = vmatpush3.bf16.msra.mxu0 %v6889_v6 }
 0xb80   :  { %6405 = vmatprep.subr.bf16.mxu0 %v6707_v0 }
 0xb82   :  { %5764 = vmatmul.mubr.f32.vlgmr.msra.gmra.mrb[6].mxu0 %v3527_v36 }
 0xb83   :  { %6407 = vmatpush3.bf16.msra.mxu0 %v6771_v12  ;;  %5782 = vmatprep.mubr.msk.f32.mxu0 %vm6708_vm1, %v6709_v1 }
 0xb84   :  { %6408 = vmatprep.subr.bf16.mxu0 %v6707_v0 }
 0xb87   :  { %6410 = vmatpush3.bf16.msra.mxu0 %v6779_v21 }
 0xb88   :  { %6411 = vmatprep.subr.bf16.mxu0 %v6707_v0 }
 0xb8b   :  { %6413 = vmatpush3.bf16.msra.mxu0 %v6795_v30 }
 0xb8c   :  { %6414 = vmatprep.subr.bf16.mxu0 %v6707_v0 }
 0xb8f   :  { %6416 = vmatpush3.bf16.msra.mxu0 %v6814_v38 }
 0xb90   :  { %6417 = vmatprep.subr.bf16.mxu0 %v6707_v0 }
 0xb92   :  { %5783 = vmatmul.mubr.f32.vlgmr.msra.gmra.mrb[6].mxu0 %v3528_v37 }
 0xb93   :  { %6419 = vmatpush3.bf16.msra.mxu0 %v6908_v7  ;;  %5801 = vmatprep.mubr.msk.f32.mxu0 %vm6708_vm1, %v6709_v1 }
 0xb94   :  { %6420 = vmatprep.subr.bf16.mxu0 %v6707_v0 }
 0xb97   :  { %6422 = vmatpush3.bf16.msra.mxu0 %v6918_v8 }
 0xb98   :  { %6423 = vmatprep.subr.bf16.mxu0 %v6707_v0 }
 0xb9b   :  { %6425 = vmatpush3.bf16.msra.mxu0 %v6928_v9 }
 0xb9c   :  { %6426 = vmatprep.subr.bf16.mxu0 %v6707_v0 }
 0xb9f   :  { %6428 = vmatpush3.bf16.msra.mxu0 %v6932_v10 }
 0xba0   :  { %6429 = vmatprep.subr.bf16.mxu0 %v6707_v0 }
 0xba2   :  { %5802 = vmatmul.mubr.f32.vlgmr.msra.gmra.mrb[6].mxu0 %v3526_v35 }
 0xba3   :  { %6431 = vmatpush3.bf16.msra.mxu0 %v6771_v12  ;;  %5820 = vmatprep.mubr.msk.f32.mxu0 %vm6708_vm1, %v6709_v1 }
 0xba4   :  { %6432 = vmatprep.subr.bf16.mxu0 %v6707_v0 }
 0xba7   :  { %6434 = vmatpush3.bf16.msra.mxu0 %v6779_v21 }
 0xba8   :  { %6435 = vmatprep.subr.bf16.mxu0 %v6707_v0 }
 0xbab   :  { %6437 = vmatpush3.bf16.msra.mxu0 %v6795_v30 }
 0xbac   :  { %6438 = vmatprep.subr.bf16.mxu0 %v6707_v0 }
 0xbaf   :  { %6440 = vmatpush3.bf16.msra.mxu0 %v6814_v38 }
 0xbb2   :  { %5821 = vmatmul.mubr.f32.vlgmr.msra.gmra.mrb[6].mxu0 %v3526_v35 }
 0xc85   :  { %v3986_v31 = vpop.f32.mrb[6].mxu0 }
 0xc86   :  { %v6519_v41 = vadd.f32 %v3986_v31, %v3449_v27  ;;  %v5822_v42 = vpop.f32.mrb[7].mxu0 }
 0xc88   :  { %v3990_v43 = vsel %vm50_vm0, %v6519_v41, 0.0  ;;  %v3994_v44 = vmul.f32 %v6519_v41, %v6519_v41 }
 0xc89   :  { %3991 = vadd.xlane.f32.xlu0 %v3990_v43 }
 0xc8a   :  { %v3995_v45 = vsel %vm50_vm0, %v3994_v44, 0.0 }
 0xc8b   :  { %3996 = vadd.xlane.f32.xlu1 %v3995_v45 }
 0xd16   :  { %v3992_v46 = vpop.xlane.xlu0 %3991 }
 0xd17   :  { %v3993_v47 = vmul.f32 0.015625, %v3992_v46 }
 0xd18   :  { %v3997_v48 = vpop.xlane.xlu1 %3996 }
 0xd19   :  { %v3999_v49 = vmul.f32 %v3993_v47, %v3993_v47  ;;  %v3998_v50 = vmul.f32 0.015625, %v3997_v48 }
 0xd1b   :  { %v4000_v51 = vsub.f32 %v3998_v50, %v3999_v49 }
 0xd1d   :  { %v4001_v53 = vadd.f32 1e-05, %v4000_v51 }
 0xd1f   :  { %6623 = vrsqrt.f32 %v4001_v53 }
 0xd29   :  { %v6624_v54 = vpop.eup %6623 }
 0xd2a   :  { %v4003_v56 = vmul.f32 %v7359_v55, %v6624_v54 }
 0xd2c   :  { %v4004_v58 = vmul.f32 %v4003_v56, %v3993_v47  ;;  %v4006_v59 = vmul.f32 %v6519_v41, %v4003_v56 }
 0xd2e   :  { %v4005_v62 = vsub.f32 %v7365_v60, %v4004_v58 }
 0xd30   :  { %v4007_v63 = vadd.f32 %v4006_v59, %v4005_v62 }
 0xd32   :  { %4009 = vst.msk [vmem:[#allocation8 + $0xc] sm:$0x3] %vm50_vm0, %v4007_v63  ;;  %v4013_v11 = vsel %vm76_vm2, %v4007_v63, 0 }
 0xd33   :  { %v4088_v13 = vand.u32 4294901760, %v4013_v11 }
 0xd35   :  { %v4089_v14 = vsub.f32 %v4013_v11, %v4088_v13 }
 0xd37   :  { %v4090_v15 = vand.u32 4294901760, %v4089_v14 }
 0xd39   :  { %v4091_v16 = vsub.f32 %v4089_v14, %v4090_v15 }
 0xd3b   :  { %v4092_v17 = vand.u32 4294901760, %v4091_v16 }
 0xd3d   :  { %5840 = vmatmul.mubr.f32.vlgmr.msra.gmra.mrb[6].mxu1 %v4092_v17 }
 0xd3e   :  { %6455 = vmatpush3.bf16.msra.mxu1 %v6843_v52  ;;  %5858 = vmatprep.mubr.msk.f32.mxu1 %vm6708_vm1, %v6709_v1  ;;  %v4011_v52 = vld [vmem:[#allocation3 + $0xe] sm:$0x3] }
 0xd3f   :  { %6456 = vmatprep.subr.bf16.mxu1 %v6707_v0 }
 0xd42   :  { %6458 = vmatpush3.bf16.msra.mxu1 %v6851_v57 }
 0xd43   :  { %6459 = vmatprep.subr.bf16.mxu1 %v6707_v0 }
 0xd46   :  { %6461 = vmatpush3.bf16.msra.mxu1 %v6858_v61 }
 0xd47   :  { %6462 = vmatprep.subr.bf16.mxu1 %v6707_v0 }
 0xd4a   :  { %6464 = vmatpush3.bf16.msra.mxu1 %v6862_v2 }
 0xd4b   :  { %6465 = vmatprep.subr.bf16.mxu1 %v6707_v0 }
 0xd4d   :  { %5859 = vmatmul.mubr.f32.vlgmr.msra.gmra.mrb[6].mxu1 %v4088_v13 }
 0xd4e   :  { %6467 = vmatpush3.bf16.msra.mxu1 %v6868_v3  ;;  %5877 = vmatprep.mubr.msk.f32.mxu1 %vm6708_vm1, %v6709_v1 }
 0xd4f   :  { %6468 = vmatprep.subr.bf16.mxu1 %v6707_v0 }
 0xd52   :  { %6470 = vmatpush3.bf16.msra.mxu1 %v6875_v4 }
 0xd53   :  { %6471 = vmatprep.subr.bf16.mxu1 %v6707_v0 }
 0xd56   :  { %6473 = vmatpush3.bf16.msra.mxu1 %v6883_v5 }
 0xd57   :  { %6474 = vmatprep.subr.bf16.mxu1 %v6707_v0 }
 0xd5a   :  { %6476 = vmatpush3.bf16.msra.mxu1 %v6889_v6 }
 0xd5b   :  { %6477 = vmatprep.subr.bf16.mxu1 %v6707_v0 }
 0xd5d   :  { %5878 = vmatmul.mubr.f32.vlgmr.msra.gmra.mrb[6].mxu1 %v4089_v14 }
 0xd5e   :  { %6479 = vmatpush3.bf16.msra.mxu1 %v6771_v12  ;;  %5896 = vmatprep.mubr.msk.f32.mxu1 %vm6708_vm1, %v6709_v1 }
 0xd5f   :  { %6480 = vmatprep.subr.bf16.mxu1 %v6707_v0 }
 0xd62   :  { %6482 = vmatpush3.bf16.msra.mxu1 %v6779_v21 }
 0xd63   :  { %6483 = vmatprep.subr.bf16.mxu1 %v6707_v0 }
 0xd66   :  { %6485 = vmatpush3.bf16.msra.mxu1 %v6795_v30 }
 0xd67   :  { %6486 = vmatprep.subr.bf16.mxu1 %v6707_v0 }
 0xd6a   :  { %6488 = vmatpush3.bf16.msra.mxu1 %v6814_v38 }
 0xd6b   :  { %6489 = vmatprep.subr.bf16.mxu1 %v6707_v0 }
 0xd6d   :  { %5897 = vmatmul.mubr.f32.vlgmr.msra.gmra.mrb[6].mxu1 %v4090_v15 }
 0xd6e   :  { %6491 = vmatpush3.bf16.msra.mxu1 %v6908_v7  ;;  %5915 = vmatprep.mubr.msk.f32.mxu1 %vm6708_vm1, %v6709_v1 }
 0xd6f   :  { %6492 = vmatprep.subr.bf16.mxu1 %v6707_v0 }
 0xd72   :  { %6494 = vmatpush3.bf16.msra.mxu1 %v6918_v8 }
 0xd73   :  { %6495 = vmatprep.subr.bf16.mxu1 %v6707_v0 }
 0xd76   :  { %6497 = vmatpush3.bf16.msra.mxu1 %v6928_v9 }
 0xd77   :  { %6498 = vmatprep.subr.bf16.mxu1 %v6707_v0 }
 0xd7a   :  { %6500 = vmatpush3.bf16.msra.mxu1 %v6932_v10 }
 0xd7b   :  { %6501 = vmatprep.subr.bf16.mxu1 %v6707_v0 }
 0xd7d   :  { %5916 = vmatmul.mubr.f32.vlgmr.msra.gmra.mrb[6].mxu1 %v4088_v13 }
 0xd7e   :  { %6503 = vmatpush3.bf16.msra.mxu1 %v6771_v12  ;;  %5934 = vmatprep.mubr.msk.f32.mxu1 %vm6708_vm1, %v6709_v1 }
 0xd7f   :  { %6504 = vmatprep.subr.bf16.mxu1 %v6707_v0 }
 0xd82   :  { %6506 = vmatpush3.bf16.msra.mxu1 %v6779_v21 }
 0xd83   :  { %6507 = vmatprep.subr.bf16.mxu1 %v6707_v0 }
 0xd86   :  { %6509 = vmatpush3.bf16.msra.mxu1 %v6795_v30 }
 0xd87   :  { %6510 = vmatprep.subr.bf16.mxu1 %v6707_v0 }
 0xd8a   :  { %6512 = vmatpush3.bf16.msra.mxu1 %v6814_v38 }
 0xd8d   :  { %5935 = vmatmul.mubr.f32.vlgmr.msra.gmra.mrb[6].mxu1 %v4088_v13 }
 0xe60   :  { %v4548_v57 = vpop.f32.mrb[6].mxu1 }
 0xe61   :  { %v6520_v61 = vadd.f32 %v4548_v57, %v4011_v52  ;;  %v5936_v12 = vpop.f32.mrb[7].mxu1 }
 0xe63   :  { %v4552_v2 = vsel %vm50_vm0, %v6520_v61, 0.0  ;;  %v4556_v1 = vmul.f32 %v6520_v61, %v6520_v61 }
 0xe64   :  { %4553 = vadd.xlane.f32.xlu0 %v4552_v2 }
 0xe65   :  { %v4557_v3 = vsel %vm50_vm0, %v4556_v1, 0.0 }
 0xe66   :  { %4558 = vadd.xlane.f32.xlu1 %v4557_v3 }
 0xef1   :  { %v4554_v21 = vpop.xlane.xlu0 %4553 }
 0xef2   :  { %v4555_v4 = vmul.f32 0.015625, %v4554_v21 }
 0xef3   :  { %v4559_v5 = vpop.xlane.xlu1 %4558 }
 0xef4   :  { %v4561_v30 = vmul.f32 %v4555_v4, %v4555_v4  ;;  %v4560_v6 = vmul.f32 0.015625, %v4559_v5 }
 0xef6   :  { %v4562_v0 = vsub.f32 %v4560_v6, %v4561_v30 }
 0xef8   :  { %v4563_v7 = vadd.f32 1e-05, %v4562_v0 }
 0xefa   :  { %6625 = vrsqrt.f32 %v4563_v7 }
 0xf04   :  { %v6626_v38 = vpop.eup %6625 }
 0xf05   :  { %v4565_v8 = vmul.f32 %v7359_v55, %v6626_v38 }
 0xf07   :  { %v4566_v9 = vmul.f32 %v4565_v8, %v4555_v4  ;;  %v4568_v18 = vmul.f32 %v6520_v61, %v4565_v8 }
 0xf09   :  { %v4567_v10 = vsub.f32 %v7365_v60, %v4566_v9 }
 0xf0b   :  { %v4569_v19 = vadd.f32 %v4568_v18, %v4567_v10 }
 0xf0d   :  { %4571 = vst.msk [vmem:[#allocation8 + $0xe] sm:$0x3] %vm50_vm0, %v4569_v19  ;;  %4572 = vst.msk [vmem:[#allocation2] sm:$0x3] %vm50_vm0, %v4569_v19 }
 0xf0e   :  { %6684 = shalt.err (!%p6681_p6)
}
 0xf0f   :  { %s6685_s28 = scalar_lea.hbm %s7444_s4, 256 }
 0xf10   :  { %p6686_p7 = scmp.ne.s32.totalorder %s7444_s4, %s6685_s28  ;;  %p6689_p8 = scmp.lt.u32.totalorder %s6685_s28, %s7444_s4 }
 0xf12   :  { %p6691_p9 = pnand %p6689_p8, %p6686_p7 }
 0xf14   :  { %6694 = shalt.err (!%p6691_p9)
}
 0xf15   :  { %4584 = dma.vmem_to_hbm [thread:$0]  %s4579_s3, 256, %s7444_s4, [#allocation5], %s6702_s25, %s6702_s25, %s6703_s26  }
 0xf16   :  { %6699 = dma.done.wait [#allocation5], 256  }
 0xf17   :  { %6700 = vsyncadd [#allocation5], 4294967040 }
 0xf18   :  { %4588 = vsyncpa [#allocation4], 1 }
 0xf19   :  { %4589 = vsyncpa [#allocation7], 1 }
 0xf1a   :  { %4590 = vsyncpa [#allocation5], 1 }

</bundles_post_ra>
